<compile_context>
chip_gen: v7x
topology: tpu7x:2x2x1
jax: 0.10.0
libtpu: 0.0.40
codegen_flags: <defaults>
</compile_context>

<pallas_src>
import math
from functools import partial

import jax
import jax.numpy as jnp
from jax.experimental import pallas as pl
from jax.experimental.pallas import tpu as pltpu


# ---------------------------------------------------------------------------
# Shared math helpers (used inside the kernel AND in the pure-JAX reference).
# ---------------------------------------------------------------------------

_LN_EPS = 1e-5


def _layernorm(x, gamma, beta, eps=_LN_EPS):
    """LayerNorm over the last dim; gamma/beta arrive broadcast-ready."""
    mu = jnp.mean(x, axis=-1, keepdims=True)
    var = jnp.mean(jnp.square(x - mu), axis=-1, keepdims=True)
    return (x - mu) * jax.lax.rsqrt(var + eps) * gamma + beta


def _gelu(x):
    # TODO(synk): PyTorch F.gelu defaults to the exact erf form; the tanh
    # approximation is used here (and in the in-script reference) since erf is
    # not guaranteed to lower in Mosaic.
    c = math.sqrt(2.0 / math.pi)
    return 0.5 * x * (1.0 + jnp.tanh(c * (x + 0.044715 * x * x * x)))


def _sigmoid(x):
    return 1.0 / (1.0 + jnp.exp(-x))


# ---------------------------------------------------------------------------
# Fused forward kernel: one grid step == one transformer layer (for one batch
# tile).  Embedding runs at l == 0, output head at l == num_layers - 1.
# ---------------------------------------------------------------------------

def _fused_step(in_refs, preds_ref, attn_ref, h_ref, *, num_heads):
    (x_ref, w_e_ref, b_e_ref, g_e_ref, be_e_ref, pos_ref,
     w_qkv_ref, b_qkv_ref, w_o_ref, b_o_ref, g1_ref, be1_ref,
     w1_ref, bf1_ref, w2_ref, bf2_ref, g2_ref, be2_ref,
     g_h_ref, be_h_ref, wp_ref, bp_ref) = in_refs

    l = pl.program_id(1)
    n_layers = pl.num_programs(1)

    # ---- l == 0: feature embedding (Linear(1,E) -> LN -> GELU) + pos enc ----
    @pl.when(l == 0)
    def _():
        emb = x_ref[...] * w_e_ref[...] + b_e_ref[...]            # (Bt,S,1)*(1,1,E)
        emb = _gelu(_layernorm(emb, g_e_ref[...], be_e_ref[...]))
        h_ref[...] = emb + pos_ref[...]                           # residual stream in VMEM

    # ---- transformer block l (activations never leave VMEM) ----------------
    x = h_ref[...]                                                # (Bt, S, E)
    Bt, S, E = x.shape
    H = num_heads
    D = E // H
    mm_dtype = w_qkv_ref.dtype            # bf16 production knob; f32 validation

    # pre-norm + fused QKV projection (one wide MXU matmul, pre-transposed W)
    h2d = _layernorm(x, g1_ref[...], be1_ref[...]).reshape(Bt * S, E)
    qkv = jnp.dot(h2d.astype(mm_dtype), w_qkv_ref[...],
                  preferred_element_type=jnp.float32) + b_qkv_ref[...]   # (Bt*S, 3E)

    scale = 1.0 / math.sqrt(D)            # folded into q (B*S*E elems, not H*S^2)
    attn_out = jnp.zeros((Bt * S, E), jnp.float32)
    for h in range(H):                    # static unroll; heads stay lane-packed
        q = (qkv[:, h * D:(h + 1) * D] * scale).reshape(Bt, S, D)
        k = qkv[:, E + h * D:E + (h + 1) * D].reshape(Bt, S, D)
        v = qkv[:, 2 * E + h * D:2 * E + (h + 1) * D].reshape(Bt, S, D)

        s = jnp.einsum('bqd,bkd->bqk', q, k, preferred_element_type=jnp.float32)
        m = jnp.max(s, axis=-1, keepdims=True)
        e = jnp.exp(s - m)
        p = e * pl.reciprocal(jnp.sum(e, axis=-1, keepdims=True), approx=True)
        # TODO(synk): attention dropout / optional mask are identity / None in
        # the eval-mode NumerAIFold forward and are not implemented here.
        if attn_ref is not None:
            attn_ref[h] = p                                       # (Bt, S, S)

        ctx = jnp.einsum('bqk,bkd->bqd', p, v, preferred_element_type=jnp.float32)
        # head-merge folded into out-proj: per-head W_o slice (D, E), so no
        # 4-D transpose or lane concat is ever emitted in-kernel.
        attn_out = attn_out + jnp.dot(ctx.reshape(Bt * S, D).astype(mm_dtype),
                                      w_o_ref[h],
                                      preferred_element_type=jnp.float32)
    attn_out = attn_out + b_o_ref[...]

    # residual + feed-forward + residual + LayerNorm (dropout = identity, eval)
    x1 = x + attn_out.reshape(Bt, S, E)
    f = jnp.dot(x1.reshape(Bt * S, E).astype(mm_dtype), w1_ref[...],
                preferred_element_type=jnp.float32) + bf1_ref[...]
    f = _gelu(f)
    f = jnp.dot(f.astype(mm_dtype), w2_ref[...],
                preferred_element_type=jnp.float32) + bf2_ref[...]
    out = _layernorm(x1 + f.reshape(Bt, S, E), g2_ref[...], be2_ref[...])
    h_ref[...] = out

    # ---- l == last: output head (LN -> mean over seq -> Linear(E,1) -> sigmoid)
    @pl.when(l == n_layers - 1)
    def _():
        ln = _layernorm(out, g_h_ref[...], be_h_ref[...])
        pooled = jnp.mean(ln, axis=1, keepdims=True)              # (Bt, 1, E)
        logit = jnp.sum(pooled * wp_ref[...], axis=-1, keepdims=True) + bp_ref[...]
        preds_ref[...] = _sigmoid(logit)                          # (Bt, 1, 1)


def _fused_kernel_no_attn(*refs, num_heads):
    _fused_step(refs[:-2], refs[-2], None, refs[-1], num_heads=num_heads)


def _fused_kernel_with_attn(*refs, num_heads):
    _fused_step(refs[:-3], refs[-3], refs[-2], refs[-1], num_heads=num_heads)


# ---------------------------------------------------------------------------
# Wrapper: one pallas_call for the whole forward.
# ---------------------------------------------------------------------------

def numeraifold_forward(x, packed, num_heads, *, return_attn=False, batch_tile=None):
    B, S, _ = x.shape
    lp = packed['layer']
    L, E = lp['w_qkv'].shape[0], lp['w_qkv'].shape[1]
    H = num_heads
    Bt = B if batch_tile is None else batch_tile
    assert B % Bt == 0
    grid = (B // Bt, L)                          # (parallel batch tiles, layers)

    def const_spec(a):                           # resident, DMA'd once
        nd = a.ndim
        return pl.BlockSpec(tuple(a.shape), lambda b, l: (0,) * nd)

    def layer_spec(a):                           # per-layer block, layer dim squeezed
        nd = a.ndim
        return pl.BlockSpec((pl.Squeezed(),) + tuple(a.shape[1:]),
                            lambda b, l: (l,) + (0,) * (nd - 1))

    ep, hp = packed['embed'], packed['head']
    pos = packed['pos'][:, :S, :]                # (1, S, E), broadcast-ready
    inputs = [
        (x, pl.BlockSpec((Bt, S, 1), lambda b, l: (b, 0, 0))),
        (ep['w'], const_spec(ep['w'])), (ep['b'], const_spec(ep['b'])),
        (ep['g'], const_spec(ep['g'])), (ep['be'], const_spec(ep['be'])),
        (pos, const_spec(pos)),
        (lp['w_qkv'], layer_spec(lp['w_qkv'])), (lp['b_qkv'], layer_spec(lp['b_qkv'])),
        (lp['w_o'], layer_spec(lp['w_o'])), (lp['b_o'], layer_spec(lp['b_o'])),
        (lp['g1'], layer_spec(lp['g1'])), (lp['be1'], layer_spec(lp['be1'])),
        (lp['w1'], layer_spec(lp['w1'])), (lp['bf1'], layer_spec(lp['bf1'])),
        (lp['w2'], layer_spec(lp['w2'])), (lp['bf2'], layer_spec(lp['bf2'])),
        (lp['g2'], layer_spec(lp['g2'])), (lp['be2'], layer_spec(lp['be2'])),
        (hp['g'], const_spec(hp['g'])), (hp['be'], const_spec(hp['be'])),
        (hp['wp'], const_spec(hp['wp'])), (hp['bp'], const_spec(hp['bp'])),
    ]
    args = [a for a, _ in inputs]
    in_specs = [s for _, s in inputs]

    preds_shape = jax.ShapeDtypeStruct((B, 1, 1), jnp.float32)
    preds_spec = pl.BlockSpec((Bt, 1, 1), lambda b, l: (b, 0, 0))
    scratch = [pltpu.VMEM((Bt, S, E), jnp.float32)]   # residual stream carry
    cparams = pltpu.CompilerParams(
        dimension_semantics=("parallel", "arbitrary"),
        vmem_limit_bytes=32 * 1024 * 1024)

    if return_attn:
        out_shape = (preds_shape,
                     jax.ShapeDtypeStruct((L, H, B, S, S), jnp.float32))
        out_specs = (preds_spec,
                     pl.BlockSpec((pl.Squeezed(), H, Bt, S, S),
                                  lambda b, l: (l, 0, b, 0, 0)))
        kernel = partial(_fused_kernel_with_attn, num_heads=num_heads)
    else:
        out_shape = preds_shape
        out_specs = preds_spec
        kernel = partial(_fused_kernel_no_attn, num_heads=num_heads)

    outs = pl.pallas_call(
        kernel,
        out_shape=out_shape,
        grid_spec=pltpu.PrefetchScalarGridSpec(
            num_scalar_prefetch=0, grid=grid,
            in_specs=in_specs, out_specs=out_specs, scratch_shapes=scratch),
        compiler_params=cparams,
    )(*args)

    if return_attn:
        preds, attn_all = outs
        # (L, H, B, S, S) -> per-layer (B, H, S, S): wrapper-side layout plumbing.
        attns = [jnp.swapaxes(attn_all[i], 0, 1) for i in range(L)]
        return preds[:, 0, 0], attns
    return outs[:, 0, 0], None


# ---------------------------------------------------------------------------
# Parameter construction (PyTorch conventions) + one-time kernel packing.
# ---------------------------------------------------------------------------

def init_params(key, num_features, num_layers, embed_dim, num_heads, ff_dim):
    E, F = embed_dim, ff_dim
    max_seq_len = max(num_features * 2, 1000)
    keys = iter(jax.random.split(key, 16 * num_layers + 16))
    nk = lambda: next(keys)

    def lin(shape, fan_in):
        bound = 1.0 / math.sqrt(fan_in)
        return jax.random.uniform(nk(), shape, jnp.float32, -bound, bound)

    def ln_pair():
        g = 1.0 + 0.1 * jax.random.uniform(nk(), (E,), jnp.float32, -1.0, 1.0)
        b = 0.1 * jax.random.uniform(nk(), (E,), jnp.float32, -1.0, 1.0)
        return g, b

    ge, bee = ln_pair()
    raw = {
        'embed': {'w': lin((E, 1), 1), 'b': lin((E,), 1), 'g': ge, 'be': bee},
        'pos': jax.random.normal(nk(), (1, max_seq_len, E), jnp.float32),
        'blocks': [],
    }
    for _ in range(num_layers):
        g1, be1 = ln_pair()
        g2, be2 = ln_pair()
        raw['blocks'].append({
            'wq': lin((E, E), E), 'bq': lin((E,), E),
            'wk': lin((E, E), E), 'bk': lin((E,), E),
            'wv': lin((E, E), E), 'bv': lin((E,), E),
            'wo': lin((E, E), E), 'bo': lin((E,), E),
            'g1': g1, 'be1': be1,
            'w1': lin((F, E), E), 'b1': lin((F,), E),
            'w2': lin((E, F), F), 'b2': lin((E,), F),
            'g2': g2, 'be2': be2,
        })
    gh, beh = ln_pair()
    raw['head'] = {'g': gh, 'be': beh, 'wp': lin((1, E), E), 'bp': lin((1,), E)}
    return raw


def pack_params(raw, num_heads, matmul_dtype=jnp.float32):
    """One-time wrapper-side layout plumbing: pre-transpose, fuse QKV, pre-split
    W_o per head, broadcast-pre-shape LN/bias params, stack layers."""
    E = raw['embed']['w'].shape[0]
    blocks = raw['blocks']
    F = blocks[0]['w1'].shape[0]
    H = num_heads
    D = E // H

    def stack(fn):
        return jnp.stack([fn(p) for p in blocks], axis=0)

    return {
        'embed': {
            'w': raw['embed']['w'].T.reshape(1, 1, E),
            'b': raw['embed']['b'].reshape(1, 1, E),
            'g': raw['embed']['g'].reshape(1, 1, E),
            'be': raw['embed']['be'].reshape(1, 1, E),
        },
        'pos': raw['pos'],                                   # (1, max_seq_len, E)
        'layer': {
            # fused, pre-transposed QKV: y = x @ w_qkv + b_qkv, cols = [q | k | v]
            'w_qkv': stack(lambda p: jnp.concatenate(
                [p['wq'].T, p['wk'].T, p['wv'].T], axis=1)).astype(matmul_dtype),
            'b_qkv': stack(lambda p: jnp.concatenate(
                [p['bq'], p['bk'], p['bv']]).reshape(1, 3 * E)),
            # out-proj pre-split per head (H, D, E): head merge folds into matmul
            'w_o': stack(lambda p: p['wo'].T.reshape(H, D, E)).astype(matmul_dtype),
            'b_o': stack(lambda p: p['bo'].reshape(1, E)),
            'g1': stack(lambda p: p['g1'].reshape(1, 1, E)),
            'be1': stack(lambda p: p['be1'].reshape(1, 1, E)),
            'w1': stack(lambda p: p['w1'].T).astype(matmul_dtype),
            'bf1': stack(lambda p: p['b1'].reshape(1, F)),
            'w2': stack(lambda p: p['w2'].T).astype(matmul_dtype),
            'bf2': stack(lambda p: p['b2'].reshape(1, E)),
            'g2': stack(lambda p: p['g2'].reshape(1, 1, E)),
            'be2': stack(lambda p: p['be2'].reshape(1, 1, E)),
        },
        'head': {
            'g': raw['head']['g'].reshape(1, 1, E),
            'be': raw['head']['be'].reshape(1, 1, E),
            'wp': raw['head']['wp'].reshape(1, 1, E),
            'bp': raw['head']['bp'].reshape(1, 1, 1),
        },
    }


# ---------------------------------------------------------------------------
# Pure-JAX reference mirroring the PyTorch forward (eval mode).
# ---------------------------------------------------------------------------

def _ref_mhsa(x, p, num_heads):
    B, S, E = x.shape
    H, D = num_heads, E // num_heads
    lin = lambda a, w, b: a @ w.T + b
    q = lin(x, p['wq'], p['bq']).reshape(B, S, H, D).transpose(0, 2, 1, 3)
    k = lin(x, p['wk'], p['bk']).reshape(B, S, H, D).transpose(0, 2, 1, 3)
    v = lin(x, p['wv'], p['bv']).reshape(B, S, H, D).transpose(0, 2, 1, 3)
    scores = jnp.einsum('bhsd,bhtd->bhst', q, k) / math.sqrt(D)
    attn = jax.nn.softmax(scores, axis=-1)
    ctx = jnp.einsum('bhst,bhtd->bhsd', attn, v).transpose(0, 2, 1, 3).reshape(B, S, E)
    return lin(ctx, p['wo'], p['bo']), attn


def reference_forward(x, raw, num_heads):
    B, S, _ = x.shape
    e = raw['embed']
    h = x @ e['w'].T + e['b']
    h = _gelu(_layernorm(h, e['g'].reshape(1, 1, -1), e['be'].reshape(1, 1, -1)))
    h = h + raw['pos'][:, :S, :]
    attns = []
    for p in raw['blocks']:
        normed = _layernorm(h, p['g1'].reshape(1, 1, -1), p['be1'].reshape(1, 1, -1))
        attn_out, attn = _ref_mhsa(normed, p, num_heads)
        h = h + attn_out
        f = _gelu(h @ p['w1'].T + p['b1'])
        f = f @ p['w2'].T + p['b2']
        h = _layernorm(h + f, p['g2'].reshape(1, 1, -1), p['be2'].reshape(1, 1, -1))
        attns.append(attn)
    hd = raw['head']
    h = _layernorm(h, hd['g'].reshape(1, 1, -1), hd['be'].reshape(1, 1, -1))
    pooled = jnp.mean(h, axis=1)
    logits = pooled @ hd['wp'].T + hd['bp']                 # (B, 1)
    return _sigmoid(logits[:, 0]), attns


# ---------------------------------------------------------------------------
# Demo / correctness check.
# ---------------------------------------------------------------------------

if __name__ == "__main__":
    # Small shapes consistent with the module: x is [batch, num_features, 1].
    B, NUM_FEATURES, EMBED_DIM, NUM_HEADS, FF_DIM, NUM_LAYERS = 2, 16, 32, 4, 64, 2
    S = NUM_FEATURES

    key = jax.random.PRNGKey(0)
    pkey, xkey = jax.random.split(key)
    raw = init_params(pkey, NUM_FEATURES, NUM_LAYERS, EMBED_DIM, NUM_HEADS, FF_DIM)
    packed = pack_params(raw, NUM_HEADS)
    x = jax.random.normal(xkey, (B, S, 1), jnp.float32)

    ref_preds, ref_attns = reference_forward(x, raw, NUM_HEADS)

    # Default path: attention writeback skipped (opt-in only, per review).
    preds, attns_none = numeraifold_forward(x, packed, NUM_HEADS)
    preds = jax.block_until_ready(preds)
    assert preds.shape == (B,)
    assert attns_none is None
    assert jnp.allclose(preds, ref_preds, atol=1e-3, rtol=1e-3)

    # Full module semantics: preds + per-layer attention weights.
    preds_a, attns = numeraifold_forward(x, packed, NUM_HEADS, return_attn=True)
    preds_a, attns = jax.block_until_ready((preds_a, attns))
    assert jnp.allclose(preds_a, ref_preds, atol=1e-3, rtol=1e-3)
    assert len(attns) == NUM_LAYERS
    assert all(a.shape == (B, NUM_HEADS, S, S) for a in attns)
    for a, ra in zip(attns, ref_attns):
        assert jnp.allclose(a, ra, atol=1e-3, rtol=1e-3)

    # Batch-tiled path (exercises the parallel grid axis used on v7x megacore).
    preds_bt, _ = numeraifold_forward(x, packed, NUM_HEADS, batch_tile=1)
    preds_bt = jax.block_until_ready(preds_bt)
    assert jnp.allclose(preds_bt, ref_preds, atol=1e-3, rtol=1e-3)

    # bf16 matmul-operand production knob (LN/softmax stay f32) - loose check.
    packed_bf16 = pack_params(raw, NUM_HEADS, matmul_dtype=jnp.bfloat16)
    preds_bf16, _ = numeraifold_forward(x, packed_bf16, NUM_HEADS)
    preds_bf16 = jax.block_until_ready(preds_bf16)
    assert jnp.allclose(preds_bf16, ref_preds, atol=5e-2, rtol=5e-2)

    print("KERNEL_OK")
</pallas_src>

<mosaic_0001>
module attributes {stable_mosaic.version = 11 : i64} {
  func.func @_fused_kernel_no_attn(%arg0: i32, %arg1: i32, %arg2: memref<2x16x1xf32, #tpu.memory_space<vmem>>, %arg3: memref<1x1x32xf32, #tpu.memory_space<vmem>>, %arg4: memref<1x1x32xf32, #tpu.memory_space<vmem>>, %arg5: memref<1x1x32xf32, #tpu.memory_space<vmem>>, %arg6: memref<1x1x32xf32, #tpu.memory_space<vmem>>, %arg7: memref<1x16x32xf32, #tpu.memory_space<vmem>>, %arg8: memref<1x32x96xf32, #tpu.memory_space<vmem>>, %arg9: memref<1x1x96xf32, #tpu.memory_space<vmem>>, %arg10: memref<1x4x8x32xf32, #tpu.memory_space<vmem>>, %arg11: memref<1x1x32xf32, #tpu.memory_space<vmem>>, %arg12: memref<1x1x1x32xf32, #tpu.memory_space<vmem>>, %arg13: memref<1x1x1x32xf32, #tpu.memory_space<vmem>>, %arg14: memref<1x32x64xf32, #tpu.memory_space<vmem>>, %arg15: memref<1x1x64xf32, #tpu.memory_space<vmem>>, %arg16: memref<1x64x32xf32, #tpu.memory_space<vmem>>, %arg17: memref<1x1x32xf32, #tpu.memory_space<vmem>>, %arg18: memref<1x1x1x32xf32, #tpu.memory_space<vmem>>, %arg19: memref<1x1x1x32xf32, #tpu.memory_space<vmem>>, %arg20: memref<1x1x32xf32, #tpu.memory_space<vmem>>, %arg21: memref<1x1x32xf32, #tpu.memory_space<vmem>>, %arg22: memref<1x1x32xf32, #tpu.memory_space<vmem>>, %arg23: memref<1x1x1xf32, #tpu.memory_space<vmem>>, %arg24: memref<2x1x1xf32, #tpu.memory_space<vmem>>, %arg25: memref<2x16x32xf32, #tpu.memory_space<vmem>>) attributes {dimension_semantics = [#tpu.dimension_semantics<parallel>, #tpu.dimension_semantics<arbitrary>], iteration_bounds = array<i64: 1, 2>, scalar_prefetch = 0 : i64, scratch_operands = 1 : i64, tpu.core_type = #tpu.core_type<tc>, window_params = [{transform_indices = @transform_0, window_bounds = array<i64: 2, 16, 1>}, {pipeline_mode = #tpu.pipeline_mode<synchronous>, transform_indices = @transform_1, window_bounds = array<i64: 1, 1, 32>}, {pipeline_mode = #tpu.pipeline_mode<synchronous>, transform_indices = @transform_2, window_bounds = array<i64: 1, 1, 32>}, {pipeline_mode = #tpu.pipeline_mode<synchronous>, transform_indices = @transform_3, window_bounds = array<i64: 1, 1, 32>}, {pipeline_mode = #tpu.pipeline_mode<synchronous>, transform_indices = @transform_4, window_bounds = array<i64: 1, 1, 32>}, {pipeline_mode = #tpu.pipeline_mode<synchronous>, transform_indices = @transform_5, window_bounds = array<i64: 1, 16, 32>}, {transform_indices = @transform_6, window_bounds = array<i64: 1, 32, 96>}, {transform_indices = @transform_7, window_bounds = array<i64: 1, 1, 96>}, {transform_indices = @transform_8, window_bounds = array<i64: 1, 4, 8, 32>}, {transform_indices = @transform_9, window_bounds = array<i64: 1, 1, 32>}, {transform_indices = @transform_10, window_bounds = array<i64: 1, 1, 1, 32>}, {transform_indices = @transform_11, window_bounds = array<i64: 1, 1, 1, 32>}, {transform_indices = @transform_12, window_bounds = array<i64: 1, 32, 64>}, {transform_indices = @transform_13, window_bounds = array<i64: 1, 1, 64>}, {transform_indices = @transform_14, window_bounds = array<i64: 1, 64, 32>}, {transform_indices = @transform_15, window_bounds = array<i64: 1, 1, 32>}, {transform_indices = @transform_16, window_bounds = array<i64: 1, 1, 1, 32>}, {transform_indices = @transform_17, window_bounds = array<i64: 1, 1, 1, 32>}, {pipeline_mode = #tpu.pipeline_mode<synchronous>, transform_indices = @transform_18, window_bounds = array<i64: 1, 1, 32>}, {pipeline_mode = #tpu.pipeline_mode<synchronous>, transform_indices = @transform_19, window_bounds = array<i64: 1, 1, 32>}, {pipeline_mode = #tpu.pipeline_mode<synchronous>, transform_indices = @transform_20, window_bounds = array<i64: 1, 1, 32>}, {pipeline_mode = #tpu.pipeline_mode<synchronous>, transform_indices = @transform_21, window_bounds = array<i64: 1, 1, 1>}, {transform_indices = @transform_22, window_bounds = array<i64: 2, 1, 1>}]} {
    %c0_i32 = arith.constant 0 : i32
    %0 = arith.cmpi eq, %arg1, %c0_i32 : i32
    %1 = arith.extui %0 : i1 to i32
    %c0_i32_0 = arith.constant 0 : i32
    %2 = arith.cmpi ne, %1, %c0_i32_0 : i32
    scf.if %2 {
      %c0_98 = arith.constant 0 : index
      %c0_99 = arith.constant 0 : index
      %c0_100 = arith.constant 0 : index
      %205 = vector.load %arg2[%c0_98, %c0_99, %c0_100] : memref<2x16x1xf32, #tpu.memory_space<vmem>>, vector<2x16x1xf32>
      %c0_101 = arith.constant 0 : index
      %c0_102 = arith.constant 0 : index
      %c0_103 = arith.constant 0 : index
      %206 = vector.load %arg3[%c0_101, %c0_102, %c0_103] : memref<1x1x32xf32, #tpu.memory_space<vmem>>, vector<1x1x32xf32>
      %207 = vector.broadcast %205 : vector<2x16x1xf32> to vector<2x16x32xf32>
      %208 = vector.broadcast %206 : vector<1x1x32xf32> to vector<2x16x32xf32>
      %209 = arith.mulf %207, %208 : vector<2x16x32xf32>
      %c0_104 = arith.constant 0 : index
      %c0_105 = arith.constant 0 : index
      %c0_106 = arith.constant 0 : index
      %210 = vector.load %arg4[%c0_104, %c0_105, %c0_106] : memref<1x1x32xf32, #tpu.memory_space<vmem>>, vector<1x1x32xf32>
      %211 = vector.broadcast %210 : vector<1x1x32xf32> to vector<2x16x32xf32>
      %212 = arith.addf %209, %211 : vector<2x16x32xf32>
      %c0_107 = arith.constant 0 : index
      %c0_108 = arith.constant 0 : index
      %c0_109 = arith.constant 0 : index
      %213 = vector.load %arg5[%c0_107, %c0_108, %c0_109] : memref<1x1x32xf32, #tpu.memory_space<vmem>>, vector<1x1x32xf32>
      %c0_110 = arith.constant 0 : index
      %c0_111 = arith.constant 0 : index
      %c0_112 = arith.constant 0 : index
      %214 = vector.load %arg6[%c0_110, %c0_111, %c0_112] : memref<1x1x32xf32, #tpu.memory_space<vmem>>, vector<1x1x32xf32>
      %cst_113 = arith.constant dense<0.000000e+00> : vector<2x16xf32>
      %215 = vector.multi_reduction <add>, %212, %cst_113 [2] : vector<2x16x32xf32> to vector<2x16xf32>
      %216 = vector.shape_cast %215 : vector<2x16xf32> to vector<2x16x1xf32>
      %cst_114 = arith.constant 3.200000e+01 : f32
      %217 = vector.broadcast %cst_114 : f32 to vector<2x16x1xf32>
      %218 = arith.divf %216, %217 : vector<2x16x1xf32>
      %219 = vector.broadcast %218 : vector<2x16x1xf32> to vector<2x16x32xf32>
      %220 = arith.subf %212, %219 : vector<2x16x32xf32>
      %221 = arith.mulf %220, %220 : vector<2x16x32xf32>
      %cst_115 = arith.constant dense<0.000000e+00> : vector<2x16xf32>
      %222 = vector.multi_reduction <add>, %221, %cst_115 [2] : vector<2x16x32xf32> to vector<2x16xf32>
      %223 = vector.shape_cast %222 : vector<2x16xf32> to vector<2x16x1xf32>
      %cst_116 = arith.constant 3.200000e+01 : f32
      %224 = vector.broadcast %cst_116 : f32 to vector<2x16x1xf32>
      %225 = arith.divf %223, %224 : vector<2x16x1xf32>
      %226 = vector.broadcast %218 : vector<2x16x1xf32> to vector<2x16x32xf32>
      %227 = arith.subf %212, %226 : vector<2x16x32xf32>
      %cst_117 = arith.constant 9.99999974E-6 : f32
      %228 = vector.broadcast %cst_117 : f32 to vector<2x16x1xf32>
      %229 = arith.addf %225, %228 : vector<2x16x1xf32>
      %230 = math.rsqrt %229 : vector<2x16x1xf32>
      %231 = vector.broadcast %230 : vector<2x16x1xf32> to vector<2x16x32xf32>
      %232 = arith.mulf %227, %231 : vector<2x16x32xf32>
      %233 = vector.broadcast %213 : vector<1x1x32xf32> to vector<2x16x32xf32>
      %234 = arith.mulf %232, %233 : vector<2x16x32xf32>
      %235 = vector.broadcast %214 : vector<1x1x32xf32> to vector<2x16x32xf32>
      %236 = arith.addf %234, %235 : vector<2x16x32xf32>
      %cst_118 = arith.constant 5.000000e-01 : f32
      %237 = vector.broadcast %cst_118 : f32 to vector<2x16x32xf32>
      %238 = arith.mulf %237, %236 : vector<2x16x32xf32>
      %cst_119 = arith.constant 4.471500e-02 : f32
      %239 = vector.broadcast %cst_119 : f32 to vector<2x16x32xf32>
      %240 = arith.mulf %239, %236 : vector<2x16x32xf32>
      %241 = arith.mulf %240, %236 : vector<2x16x32xf32>
      %242 = arith.mulf %241, %236 : vector<2x16x32xf32>
      %243 = arith.addf %236, %242 : vector<2x16x32xf32>
      %cst_120 = arith.constant 0.797884583 : f32
      %244 = vector.broadcast %cst_120 : f32 to vector<2x16x32xf32>
      %245 = arith.mulf %244, %243 : vector<2x16x32xf32>
      %246 = math.tanh %245 : vector<2x16x32xf32>
      %cst_121 = arith.constant 1.000000e+00 : f32
      %247 = vector.broadcast %cst_121 : f32 to vector<2x16x32xf32>
      %248 = arith.addf %247, %246 : vector<2x16x32xf32>
      %249 = arith.mulf %238, %248 : vector<2x16x32xf32>
      %c0_122 = arith.constant 0 : index
      %c0_123 = arith.constant 0 : index
      %c0_124 = arith.constant 0 : index
      %250 = vector.load %arg7[%c0_122, %c0_123, %c0_124] : memref<1x16x32xf32, #tpu.memory_space<vmem>>, vector<1x16x32xf32>
      %251 = vector.broadcast %250 : vector<1x16x32xf32> to vector<2x16x32xf32>
      %252 = arith.addf %249, %251 : vector<2x16x32xf32>
      %c0_125 = arith.constant 0 : index
      %c0_126 = arith.constant 0 : index
      %c0_127 = arith.constant 0 : index
      %253 = vector.load %arg25[%c0_125, %c0_126, %c0_127] : memref<2x16x32xf32, #tpu.memory_space<vmem>>, vector<2x16x32xf32>
      tpu.vector_store %arg25[%c0_125, %c0_126, %c0_127], %252 {strides = array<i32>} : memref<2x16x32xf32, #tpu.memory_space<vmem>>, vector<2x16x32xf32>,
    } else {
    }
    %c0 = arith.constant 0 : index
    %c0_1 = arith.constant 0 : index
    %c0_2 = arith.constant 0 : index
    %3 = vector.load %arg25[%c0, %c0_1, %c0_2] : memref<2x16x32xf32, #tpu.memory_space<vmem>>, vector<2x16x32xf32>
    %c0_3 = arith.constant 0 : index
    %c0_4 = arith.constant 0 : index
    %c0_5 = arith.constant 0 : index
    %c0_6 = arith.constant 0 : index
    %4 = vector.load %arg12[%c0_3, %c0_4, %c0_5, %c0_6] : memref<1x1x1x32xf32, #tpu.memory_space<vmem>>, vector<1x1x1x32xf32>
    %5 = vector.shape_cast %4 : vector<1x1x1x32xf32> to vector<1x1x32xf32>
    %c0_7 = arith.constant 0 : index
    %c0_8 = arith.constant 0 : index
    %c0_9 = arith.constant 0 : index
    %c0_10 = arith.constant 0 : index
    %6 = vector.load %arg13[%c0_7, %c0_8, %c0_9, %c0_10] : memref<1x1x1x32xf32, #tpu.memory_space<vmem>>, vector<1x1x1x32xf32>
    %7 = vector.shape_cast %6 : vector<1x1x1x32xf32> to vector<1x1x32xf32>
    %cst = arith.constant dense<0.000000e+00> : vector<2x16xf32>
    %8 = vector.multi_reduction <add>, %3, %cst [2] : vector<2x16x32xf32> to vector<2x16xf32>
    %9 = vector.shape_cast %8 : vector<2x16xf32> to vector<2x16x1xf32>
    %cst_11 = arith.constant 3.200000e+01 : f32
    %10 = vector.broadcast %cst_11 : f32 to vector<2x16x1xf32>
    %11 = arith.divf %9, %10 : vector<2x16x1xf32>
    %12 = vector.broadcast %11 : vector<2x16x1xf32> to vector<2x16x32xf32>
    %13 = arith.subf %3, %12 : vector<2x16x32xf32>
    %14 = arith.mulf %13, %13 : vector<2x16x32xf32>
    %cst_12 = arith.constant dense<0.000000e+00> : vector<2x16xf32>
    %15 = vector.multi_reduction <add>, %14, %cst_12 [2] : vector<2x16x32xf32> to vector<2x16xf32>
    %16 = vector.shape_cast %15 : vector<2x16xf32> to vector<2x16x1xf32>
    %cst_13 = arith.constant 3.200000e+01 : f32
    %17 = vector.broadcast %cst_13 : f32 to vector<2x16x1xf32>
    %18 = arith.divf %16, %17 : vector<2x16x1xf32>
    %19 = vector.broadcast %11 : vector<2x16x1xf32> to vector<2x16x32xf32>
    %20 = arith.subf %3, %19 : vector<2x16x32xf32>
    %cst_14 = arith.constant 9.99999974E-6 : f32
    %21 = vector.broadcast %cst_14 : f32 to vector<2x16x1xf32>
    %22 = arith.addf %18, %21 : vector<2x16x1xf32>
    %23 = math.rsqrt %22 : vector<2x16x1xf32>
    %24 = vector.broadcast %23 : vector<2x16x1xf32> to vector<2x16x32xf32>
    %25 = arith.mulf %20, %24 : vector<2x16x32xf32>
    %26 = vector.broadcast %5 : vector<1x1x32xf32> to vector<2x16x32xf32>
    %27 = arith.mulf %25, %26 : vector<2x16x32xf32>
    %28 = vector.broadcast %7 : vector<1x1x32xf32> to vector<2x16x32xf32>
    %29 = arith.addf %27, %28 : vector<2x16x32xf32>
    %30 = vector.shape_cast %29 : vector<2x16x32xf32> to vector<32x32xf32>
    %c0_15 = arith.constant 0 : index
    %c0_16 = arith.constant 0 : index
    %c0_17 = arith.constant 0 : index
    %31 = vector.load %arg8[%c0_15, %c0_16, %c0_17] : memref<1x32x96xf32, #tpu.memory_space<vmem>>, vector<1x32x96xf32>
    %32 = vector.shape_cast %31 : vector<1x32x96xf32> to vector<32x96xf32>
    %cst_18 = arith.constant dense<0.000000e+00> : vector<32x96xf32>
    %33 = tpu.matmul %30, %32, %cst_18 {dimension_numbers = #tpu.dot_dimension_numbers<[1], [0], [0], [1], [0, 0, 1, 1], [], []>} : vector<32x32xf32>, vector<32x96xf32>, vector<32x96xf32> -> vector<32x96xf32>
    %c0_19 = arith.constant 0 : index
    %c0_20 = arith.constant 0 : index
    %c0_21 = arith.constant 0 : index
    %34 = vector.load %arg9[%c0_19, %c0_20, %c0_21] : memref<1x1x96xf32, #tpu.memory_space<vmem>>, vector<1x1x96xf32>
    %35 = vector.shape_cast %34 : vector<1x1x96xf32> to vector<1x96xf32>
    %36 = vector.broadcast %35 : vector<1x96xf32> to vector<32x96xf32>
    %37 = arith.addf %33, %36 : vector<32x96xf32>
    %cst_22 = arith.constant 0.000000e+00 : f32
    %38 = vector.broadcast %cst_22 : f32 to vector<32x32xf32>
    %39 = vector.extract_strided_slice %37 {offsets = [0, 0], sizes = [32, 8], strides = [1, 1]} : vector<32x96xf32> to vector<32x8xf32>
    %cst_23 = arith.constant 0.353553385 : f32
    %40 = vector.broadcast %cst_23 : f32 to vector<32x8xf32>
    %41 = arith.mulf %39, %40 : vector<32x8xf32>
    %42 = vector.shape_cast %41 : vector<32x8xf32> to vector<2x16x8xf32>
    %43 = vector.extract_strided_slice %37 {offsets = [0, 32], sizes = [32, 8], strides = [1, 1]} : vector<32x96xf32> to vector<32x8xf32>
    %44 = vector.shape_cast %43 : vector<32x8xf32> to vector<2x16x8xf32>
    %45 = vector.extract_strided_slice %37 {offsets = [0, 64], sizes = [32, 8], strides = [1, 1]} : vector<32x96xf32> to vector<32x8xf32>
    %46 = vector.shape_cast %45 : vector<32x8xf32> to vector<2x16x8xf32>
    "tpu.trace_start"() <{level = 10 : i32, message = "bqd,bkd->bqk"}> : () -> ()
    %cst_24 = arith.constant dense<0.000000e+00> : vector<2x16x16xf32>
    %47 = tpu.matmul %42, %44, %cst_24 {dimension_numbers = #tpu.dot_dimension_numbers<[2], [2], [1], [1], [0, 0, 0, 1, 1, 1], [0], [0]>} : vector<2x16x8xf32>, vector<2x16x8xf32>, vector<2x16x16xf32> -> vector<2x16x16xf32>
    "tpu.trace_stop"() : () -> ()
    %cst_25 = arith.constant dense<0xFF800000> : vector<2x16xf32>
    %48 = vector.multi_reduction <maximumf>, %47, %cst_25 [2] : vector<2x16x16xf32> to vector<2x16xf32>
    %49 = vector.shape_cast %48 : vector<2x16xf32> to vector<2x16x1xf32>
    %50 = vector.broadcast %49 : vector<2x16x1xf32> to vector<2x16x16xf32>
    %51 = arith.subf %47, %50 : vector<2x16x16xf32>
    %52 = math.exp %51 : vector<2x16x16xf32>
    %cst_26 = arith.constant dense<0.000000e+00> : vector<2x16xf32>
    %53 = vector.multi_reduction <add>, %52, %cst_26 [2] : vector<2x16x16xf32> to vector<2x16xf32>
    %54 = vector.shape_cast %53 : vector<2x16xf32> to vector<2x16x1xf32>
    %55 = tpu.reciprocal %54 {approx = true} : vector<2x16x1xf32> -> vector<2x16x1xf32>
    %56 = vector.broadcast %55 : vector<2x16x1xf32> to vector<2x16x16xf32>
    %57 = arith.mulf %52, %56 : vector<2x16x16xf32>
    "tpu.trace_start"() <{level = 10 : i32, message = "bqk,bkd->bqd"}> : () -> ()
    %cst_27 = arith.constant dense<0.000000e+00> : vector<2x16x8xf32>
    %58 = tpu.matmul %57, %46, %cst_27 {dimension_numbers = #tpu.dot_dimension_numbers<[2], [1], [1], [2], [0, 0, 0, 1, 1, 2], [0], [0]>} : vector<2x16x16xf32>, vector<2x16x8xf32>, vector<2x16x8xf32> -> vector<2x16x8xf32>
    "tpu.trace_stop"() : () -> ()
    %59 = vector.shape_cast %58 : vector<2x16x8xf32> to vector<32x8xf32>
    %c0_28 = arith.constant 0 : index
    %c0_29 = arith.constant 0 : index
    %c0_30 = arith.constant 0 : index
    %c0_31 = arith.constant 0 : index
    %60 = vector.load %arg10[%c0_28, %c0_29, %c0_30, %c0_31] : memref<1x4x8x32xf32, #tpu.memory_space<vmem>>, vector<1x1x8x32xf32>
    %61 = vector.shape_cast %60 : vector<1x1x8x32xf32> to vector<8x32xf32>
    %cst_32 = arith.constant dense<0.000000e+00> : vector<32x32xf32>
    %62 = tpu.matmul %59, %61, %cst_32 {dimension_numbers = #tpu.dot_dimension_numbers<[1], [0], [0], [1], [0, 0, 1, 1], [], []>} : vector<32x8xf32>, vector<8x32xf32>, vector<32x32xf32> -> vector<32x32xf32>
    %63 = arith.addf %38, %62 : vector<32x32xf32>
    %64 = vector.extract_strided_slice %37 {offsets = [0, 8], sizes = [32, 8], strides = [1, 1]} : vector<32x96xf32> to vector<32x8xf32>
    %cst_33 = arith.constant 0.353553385 : f32
    %65 = vector.broadcast %cst_33 : f32 to vector<32x8xf32>
    %66 = arith.mulf %64, %65 : vector<32x8xf32>
    %67 = vector.shape_cast %66 : vector<32x8xf32> to vector<2x16x8xf32>
    %68 = vector.extract_strided_slice %37 {offsets = [0, 40], sizes = [32, 8], strides = [1, 1]} : vector<32x96xf32> to vector<32x8xf32>
    %69 = vector.shape_cast %68 : vector<32x8xf32> to vector<2x16x8xf32>
    %70 = vector.extract_strided_slice %37 {offsets = [0, 72], sizes = [32, 8], strides = [1, 1]} : vector<32x96xf32> to vector<32x8xf32>
    %71 = vector.shape_cast %70 : vector<32x8xf32> to vector<2x16x8xf32>
    "tpu.trace_start"() <{level = 10 : i32, message = "bqd,bkd->bqk"}> : () -> ()
    %cst_34 = arith.constant dense<0.000000e+00> : vector<2x16x16xf32>
    %72 = tpu.matmul %67, %69, %cst_34 {dimension_numbers = #tpu.dot_dimension_numbers<[2], [2], [1], [1], [0, 0, 0, 1, 1, 1], [0], [0]>} : vector<2x16x8xf32>, vector<2x16x8xf32>, vector<2x16x16xf32> -> vector<2x16x16xf32>
    "tpu.trace_stop"() : () -> ()
    %cst_35 = arith.constant dense<0xFF800000> : vector<2x16xf32>
    %73 = vector.multi_reduction <maximumf>, %72, %cst_35 [2] : vector<2x16x16xf32> to vector<2x16xf32>
    %74 = vector.shape_cast %73 : vector<2x16xf32> to vector<2x16x1xf32>
    %75 = vector.broadcast %74 : vector<2x16x1xf32> to vector<2x16x16xf32>
    %76 = arith.subf %72, %75 : vector<2x16x16xf32>
    %77 = math.exp %76 : vector<2x16x16xf32>
    %cst_36 = arith.constant dense<0.000000e+00> : vector<2x16xf32>
    %78 = vector.multi_reduction <add>, %77, %cst_36 [2] : vector<2x16x16xf32> to vector<2x16xf32>
    %79 = vector.shape_cast %78 : vector<2x16xf32> to vector<2x16x1xf32>
    %80 = tpu.reciprocal %79 {approx = true} : vector<2x16x1xf32> -> vector<2x16x1xf32>
    %81 = vector.broadcast %80 : vector<2x16x1xf32> to vector<2x16x16xf32>
    %82 = arith.mulf %77, %81 : vector<2x16x16xf32>
    "tpu.trace_start"() <{level = 10 : i32, message = "bqk,bkd->bqd"}> : () -> ()
    %cst_37 = arith.constant dense<0.000000e+00> : vector<2x16x8xf32>
    %83 = tpu.matmul %82, %71, %cst_37 {dimension_numbers = #tpu.dot_dimension_numbers<[2], [1], [1], [2], [0, 0, 0, 1, 1, 2], [0], [0]>} : vector<2x16x16xf32>, vector<2x16x8xf32>, vector<2x16x8xf32> -> vector<2x16x8xf32>
    "tpu.trace_stop"() : () -> ()
    %84 = vector.shape_cast %83 : vector<2x16x8xf32> to vector<32x8xf32>
    %c0_38 = arith.constant 0 : index
    %c1 = arith.constant 1 : index
    %c0_39 = arith.constant 0 : index
    %c0_40 = arith.constant 0 : index
    %85 = vector.load %arg10[%c0_38, %c1, %c0_39, %c0_40] : memref<1x4x8x32xf32, #tpu.memory_space<vmem>>, vector<1x1x8x32xf32>
    %86 = vector.shape_cast %85 : vector<1x1x8x32xf32> to vector<8x32xf32>
    %cst_41 = arith.constant dense<0.000000e+00> : vector<32x32xf32>
    %87 = tpu.matmul %84, %86, %cst_41 {dimension_numbers = #tpu.dot_dimension_numbers<[1], [0], [0], [1], [0, 0, 1, 1], [], []>} : vector<32x8xf32>, vector<8x32xf32>, vector<32x32xf32> -> vector<32x32xf32>
    %88 = arith.addf %63, %87 : vector<32x32xf32>
    %89 = vector.extract_strided_slice %37 {offsets = [0, 16], sizes = [32, 8], strides = [1, 1]} : vector<32x96xf32> to vector<32x8xf32>
    %cst_42 = arith.constant 0.353553385 : f32
    %90 = vector.broadcast %cst_42 : f32 to vector<32x8xf32>
    %91 = arith.mulf %89, %90 : vector<32x8xf32>
    %92 = vector.shape_cast %91 : vector<32x8xf32> to vector<2x16x8xf32>
    %93 = vector.extract_strided_slice %37 {offsets = [0, 48], sizes = [32, 8], strides = [1, 1]} : vector<32x96xf32> to vector<32x8xf32>
    %94 = vector.shape_cast %93 : vector<32x8xf32> to vector<2x16x8xf32>
    %95 = vector.extract_strided_slice %37 {offsets = [0, 80], sizes = [32, 8], strides = [1, 1]} : vector<32x96xf32> to vector<32x8xf32>
    %96 = vector.shape_cast %95 : vector<32x8xf32> to vector<2x16x8xf32>
    "tpu.trace_start"() <{level = 10 : i32, message = "bqd,bkd->bqk"}> : () -> ()
    %cst_43 = arith.constant dense<0.000000e+00> : vector<2x16x16xf32>
    %97 = tpu.matmul %92, %94, %cst_43 {dimension_numbers = #tpu.dot_dimension_numbers<[2], [2], [1], [1], [0, 0, 0, 1, 1, 1], [0], [0]>} : vector<2x16x8xf32>, vector<2x16x8xf32>, vector<2x16x16xf32> -> vector<2x16x16xf32>
    "tpu.trace_stop"() : () -> ()
    %cst_44 = arith.constant dense<0xFF800000> : vector<2x16xf32>
    %98 = vector.multi_reduction <maximumf>, %97, %cst_44 [2] : vector<2x16x16xf32> to vector<2x16xf32>
    %99 = vector.shape_cast %98 : vector<2x16xf32> to vector<2x16x1xf32>
    %100 = vector.broadcast %99 : vector<2x16x1xf32> to vector<2x16x16xf32>
    %101 = arith.subf %97, %100 : vector<2x16x16xf32>
    %102 = math.exp %101 : vector<2x16x16xf32>
    %cst_45 = arith.constant dense<0.000000e+00> : vector<2x16xf32>
    %103 = vector.multi_reduction <add>, %102, %cst_45 [2] : vector<2x16x16xf32> to vector<2x16xf32>
    %104 = vector.shape_cast %103 : vector<2x16xf32> to vector<2x16x1xf32>
    %105 = tpu.reciprocal %104 {approx = true} : vector<2x16x1xf32> -> vector<2x16x1xf32>
    %106 = vector.broadcast %105 : vector<2x16x1xf32> to vector<2x16x16xf32>
    %107 = arith.mulf %102, %106 : vector<2x16x16xf32>
    "tpu.trace_start"() <{level = 10 : i32, message = "bqk,bkd->bqd"}> : () -> ()
    %cst_46 = arith.constant dense<0.000000e+00> : vector<2x16x8xf32>
    %108 = tpu.matmul %107, %96, %cst_46 {dimension_numbers = #tpu.dot_dimension_numbers<[2], [1], [1], [2], [0, 0, 0, 1, 1, 2], [0], [0]>} : vector<2x16x16xf32>, vector<2x16x8xf32>, vector<2x16x8xf32> -> vector<2x16x8xf32>
    "tpu.trace_stop"() : () -> ()
    %109 = vector.shape_cast %108 : vector<2x16x8xf32> to vector<32x8xf32>
    %c0_47 = arith.constant 0 : index
    %c2 = arith.constant 2 : index
    %c0_48 = arith.constant 0 : index
    %c0_49 = arith.constant 0 : index
    %110 = vector.load %arg10[%c0_47, %c2, %c0_48, %c0_49] : memref<1x4x8x32xf32, #tpu.memory_space<vmem>>, vector<1x1x8x32xf32>
    %111 = vector.shape_cast %110 : vector<1x1x8x32xf32> to vector<8x32xf32>
    %cst_50 = arith.constant dense<0.000000e+00> : vector<32x32xf32>
    %112 = tpu.matmul %109, %111, %cst_50 {dimension_numbers = #tpu.dot_dimension_numbers<[1], [0], [0], [1], [0, 0, 1, 1], [], []>} : vector<32x8xf32>, vector<8x32xf32>, vector<32x32xf32> -> vector<32x32xf32>
    %113 = arith.addf %88, %112 : vector<32x32xf32>
    %114 = vector.extract_strided_slice %37 {offsets = [0, 24], sizes = [32, 8], strides = [1, 1]} : vector<32x96xf32> to vector<32x8xf32>
    %cst_51 = arith.constant 0.353553385 : f32
    %115 = vector.broadcast %cst_51 : f32 to vector<32x8xf32>
    %116 = arith.mulf %114, %115 : vector<32x8xf32>
    %117 = vector.shape_cast %116 : vector<32x8xf32> to vector<2x16x8xf32>
    %118 = vector.extract_strided_slice %37 {offsets = [0, 56], sizes = [32, 8], strides = [1, 1]} : vector<32x96xf32> to vector<32x8xf32>
    %119 = vector.shape_cast %118 : vector<32x8xf32> to vector<2x16x8xf32>
    %120 = vector.extract_strided_slice %37 {offsets = [0, 88], sizes = [32, 8], strides = [1, 1]} : vector<32x96xf32> to vector<32x8xf32>
    %121 = vector.shape_cast %120 : vector<32x8xf32> to vector<2x16x8xf32>
    "tpu.trace_start"() <{level = 10 : i32, message = "bqd,bkd->bqk"}> : () -> ()
    %cst_52 = arith.constant dense<0.000000e+00> : vector<2x16x16xf32>
    %122 = tpu.matmul %117, %119, %cst_52 {dimension_numbers = #tpu.dot_dimension_numbers<[2], [2], [1], [1], [0, 0, 0, 1, 1, 1], [0], [0]>} : vector<2x16x8xf32>, vector<2x16x8xf32>, vector<2x16x16xf32> -> vector<2x16x16xf32>
    "tpu.trace_stop"() : () -> ()
    %cst_53 = arith.constant dense<0xFF800000> : vector<2x16xf32>
    %123 = vector.multi_reduction <maximumf>, %122, %cst_53 [2] : vector<2x16x16xf32> to vector<2x16xf32>
    %124 = vector.shape_cast %123 : vector<2x16xf32> to vector<2x16x1xf32>
    %125 = vector.broadcast %124 : vector<2x16x1xf32> to vector<2x16x16xf32>
    %126 = arith.subf %122, %125 : vector<2x16x16xf32>
    %127 = math.exp %126 : vector<2x16x16xf32>
    %cst_54 = arith.constant dense<0.000000e+00> : vector<2x16xf32>
    %128 = vector.multi_reduction <add>, %127, %cst_54 [2] : vector<2x16x16xf32> to vector<2x16xf32>
    %129 = vector.shape_cast %128 : vector<2x16xf32> to vector<2x16x1xf32>
    %130 = tpu.reciprocal %129 {approx = true} : vector<2x16x1xf32> -> vector<2x16x1xf32>
    %131 = vector.broadcast %130 : vector<2x16x1xf32> to vector<2x16x16xf32>
    %132 = arith.mulf %127, %131 : vector<2x16x16xf32>
    "tpu.trace_start"() <{level = 10 : i32, message = "bqk,bkd->bqd"}> : () -> ()
    %cst_55 = arith.constant dense<0.000000e+00> : vector<2x16x8xf32>
    %133 = tpu.matmul %132, %121, %cst_55 {dimension_numbers = #tpu.dot_dimension_numbers<[2], [1], [1], [2], [0, 0, 0, 1, 1, 2], [0], [0]>} : vector<2x16x16xf32>, vector<2x16x8xf32>, vector<2x16x8xf32> -> vector<2x16x8xf32>
    "tpu.trace_stop"() : () -> ()
    %134 = vector.shape_cast %133 : vector<2x16x8xf32> to vector<32x8xf32>
    %c0_56 = arith.constant 0 : index
    %c3 = arith.constant 3 : index
    %c0_57 = arith.constant 0 : index
    %c0_58 = arith.constant 0 : index
    %135 = vector.load %arg10[%c0_56, %c3, %c0_57, %c0_58] : memref<1x4x8x32xf32, #tpu.memory_space<vmem>>, vector<1x1x8x32xf32>
    %136 = vector.shape_cast %135 : vector<1x1x8x32xf32> to vector<8x32xf32>
    %cst_59 = arith.constant dense<0.000000e+00> : vector<32x32xf32>
    %137 = tpu.matmul %134, %136, %cst_59 {dimension_numbers = #tpu.dot_dimension_numbers<[1], [0], [0], [1], [0, 0, 1, 1], [], []>} : vector<32x8xf32>, vector<8x32xf32>, vector<32x32xf32> -> vector<32x32xf32>
    %138 = arith.addf %113, %137 : vector<32x32xf32>
    %c0_60 = arith.constant 0 : index
    %c0_61 = arith.constant 0 : index
    %c0_62 = arith.constant 0 : index
    %139 = vector.load %arg11[%c0_60, %c0_61, %c0_62] : memref<1x1x32xf32, #tpu.memory_space<vmem>>, vector<1x1x32xf32>
    %140 = vector.shape_cast %139 : vector<1x1x32xf32> to vector<1x32xf32>
    %141 = vector.broadcast %140 : vector<1x32xf32> to vector<32x32xf32>
    %142 = arith.addf %138, %141 : vector<32x32xf32>
    %143 = vector.shape_cast %142 : vector<32x32xf32> to vector<2x16x32xf32>
    %144 = arith.addf %3, %143 : vector<2x16x32xf32>
    %145 = vector.shape_cast %144 : vector<2x16x32xf32> to vector<32x32xf32>
    %c0_63 = arith.constant 0 : index
    %c0_64 = arith.constant 0 : index
    %c0_65 = arith.constant 0 : index
    %146 = vector.load %arg14[%c0_63, %c0_64, %c0_65] : memref<1x32x64xf32, #tpu.memory_space<vmem>>, vector<1x32x64xf32>
    %147 = vector.shape_cast %146 : vector<1x32x64xf32> to vector<32x64xf32>
    %cst_66 = arith.constant dense<0.000000e+00> : vector<32x64xf32>
    %148 = tpu.matmul %145, %147, %cst_66 {dimension_numbers = #tpu.dot_dimension_numbers<[1], [0], [0], [1], [0, 0, 1, 1], [], []>} : vector<32x32xf32>, vector<32x64xf32>, vector<32x64xf32> -> vector<32x64xf32>
    %c0_67 = arith.constant 0 : index
    %c0_68 = arith.constant 0 : index
    %c0_69 = arith.constant 0 : index
    %149 = vector.load %arg15[%c0_67, %c0_68, %c0_69] : memref<1x1x64xf32, #tpu.memory_space<vmem>>, vector<1x1x64xf32>
    %150 = vector.shape_cast %149 : vector<1x1x64xf32> to vector<1x64xf32>
    %151 = vector.broadcast %150 : vector<1x64xf32> to vector<32x64xf32>
    %152 = arith.addf %148, %151 : vector<32x64xf32>
    %cst_70 = arith.constant 5.000000e-01 : f32
    %153 = vector.broadcast %cst_70 : f32 to vector<32x64xf32>
    %154 = arith.mulf %153, %152 : vector<32x64xf32>
    %cst_71 = arith.constant 4.471500e-02 : f32
    %155 = vector.broadcast %cst_71 : f32 to vector<32x64xf32>
    %156 = arith.mulf %155, %152 : vector<32x64xf32>
    %157 = arith.mulf %156, %152 : vector<32x64xf32>
    %158 = arith.mulf %157, %152 : vector<32x64xf32>
    %159 = arith.addf %152, %158 : vector<32x64xf32>
    %cst_72 = arith.constant 0.797884583 : f32
    %160 = vector.broadcast %cst_72 : f32 to vector<32x64xf32>
    %161 = arith.mulf %160, %159 : vector<32x64xf32>
    %162 = math.tanh %161 : vector<32x64xf32>
    %cst_73 = arith.constant 1.000000e+00 : f32
    %163 = vector.broadcast %cst_73 : f32 to vector<32x64xf32>
    %164 = arith.addf %163, %162 : vector<32x64xf32>
    %165 = arith.mulf %154, %164 : vector<32x64xf32>
    %c0_74 = arith.constant 0 : index
    %c0_75 = arith.constant 0 : index
    %c0_76 = arith.constant 0 : index
    %166 = vector.load %arg16[%c0_74, %c0_75, %c0_76] : memref<1x64x32xf32, #tpu.memory_space<vmem>>, vector<1x64x32xf32>
    %167 = vector.shape_cast %166 : vector<1x64x32xf32> to vector<64x32xf32>
    %cst_77 = arith.constant dense<0.000000e+00> : vector<32x32xf32>
    %168 = tpu.matmul %165, %167, %cst_77 {dimension_numbers = #tpu.dot_dimension_numbers<[1], [0], [0], [1], [0, 0, 1, 1], [], []>} : vector<32x64xf32>, vector<64x32xf32>, vector<32x32xf32> -> vector<32x32xf32>
    %c0_78 = arith.constant 0 : index
    %c0_79 = arith.constant 0 : index
    %c0_80 = arith.constant 0 : index
    %169 = vector.load %arg17[%c0_78, %c0_79, %c0_80] : memref<1x1x32xf32, #tpu.memory_space<vmem>>, vector<1x1x32xf32>
    %170 = vector.shape_cast %169 : vector<1x1x32xf32> to vector<1x32xf32>
    %171 = vector.broadcast %170 : vector<1x32xf32> to vector<32x32xf32>
    %172 = arith.addf %168, %171 : vector<32x32xf32>
    %173 = vector.shape_cast %172 : vector<32x32xf32> to vector<2x16x32xf32>
    %174 = arith.addf %144, %173 : vector<2x16x32xf32>
    %c0_81 = arith.constant 0 : index
    %c0_82 = arith.constant 0 : index
    %c0_83 = arith.constant 0 : index
    %c0_84 = arith.constant 0 : index
    %175 = vector.load %arg18[%c0_81, %c0_82, %c0_83, %c0_84] : memref<1x1x1x32xf32, #tpu.memory_space<vmem>>, vector<1x1x1x32xf32>
    %176 = vector.shape_cast %175 : vector<1x1x1x32xf32> to vector<1x1x32xf32>
    %c0_85 = arith.constant 0 : index
    %c0_86 = arith.constant 0 : index
    %c0_87 = arith.constant 0 : index
    %c0_88 = arith.constant 0 : index
    %177 = vector.load %arg19[%c0_85, %c0_86, %c0_87, %c0_88] : memref<1x1x1x32xf32, #tpu.memory_space<vmem>>, vector<1x1x1x32xf32>
    %178 = vector.shape_cast %177 : vector<1x1x1x32xf32> to vector<1x1x32xf32>
    %cst_89 = arith.constant dense<0.000000e+00> : vector<2x16xf32>
    %179 = vector.multi_reduction <add>, %174, %cst_89 [2] : vector<2x16x32xf32> to vector<2x16xf32>
    %180 = vector.shape_cast %179 : vector<2x16xf32> to vector<2x16x1xf32>
    %cst_90 = arith.constant 3.200000e+01 : f32
    %181 = vector.broadcast %cst_90 : f32 to vector<2x16x1xf32>
    %182 = arith.divf %180, %181 : vector<2x16x1xf32>
    %183 = vector.broadcast %182 : vector<2x16x1xf32> to vector<2x16x32xf32>
    %184 = arith.subf %174, %183 : vector<2x16x32xf32>
    %185 = arith.mulf %184, %184 : vector<2x16x32xf32>
    %cst_91 = arith.constant dense<0.000000e+00> : vector<2x16xf32>
    %186 = vector.multi_reduction <add>, %185, %cst_91 [2] : vector<2x16x32xf32> to vector<2x16xf32>
    %187 = vector.shape_cast %186 : vector<2x16xf32> to vector<2x16x1xf32>
    %cst_92 = arith.constant 3.200000e+01 : f32
    %188 = vector.broadcast %cst_92 : f32 to vector<2x16x1xf32>
    %189 = arith.divf %187, %188 : vector<2x16x1xf32>
    %190 = vector.broadcast %182 : vector<2x16x1xf32> to vector<2x16x32xf32>
    %191 = arith.subf %174, %190 : vector<2x16x32xf32>
    %cst_93 = arith.constant 9.99999974E-6 : f32
    %192 = vector.broadcast %cst_93 : f32 to vector<2x16x1xf32>
    %193 = arith.addf %189, %192 : vector<2x16x1xf32>
    %194 = math.rsqrt %193 : vector<2x16x1xf32>
    %195 = vector.broadcast %194 : vector<2x16x1xf32> to vector<2x16x32xf32>
    %196 = arith.mulf %191, %195 : vector<2x16x32xf32>
    %197 = vector.broadcast %176 : vector<1x1x32xf32> to vector<2x16x32xf32>
    %198 = arith.mulf %196, %197 : vector<2x16x32xf32>
    %199 = vector.broadcast %178 : vector<1x1x32xf32> to vector<2x16x32xf32>
    %200 = arith.addf %198, %199 : vector<2x16x32xf32>
    %c0_94 = arith.constant 0 : index
    %c0_95 = arith.constant 0 : index
    %c0_96 = arith.constant 0 : index
    %201 = vector.load %arg25[%c0_94, %c0_95, %c0_96] : memref<2x16x32xf32, #tpu.memory_space<vmem>>, vector<2x16x32xf32>
    tpu.vector_store %arg25[%c0_94, %c0_95, %c0_96], %200 {strides = array<i32>} : memref<2x16x32xf32, #tpu.memory_space<vmem>>, vector<2x16x32xf32>,
    %c1_i32 = arith.constant 1 : i32
    %202 = arith.cmpi eq, %arg1, %c1_i32 : i32
    %203 = arith.extui %202 : i1 to i32
    %c0_i32_97 = arith.constant 0 : i32
    %204 = arith.cmpi ne, %203, %c0_i32_97 : i32
    scf.if %204 {
      %c0_98 = arith.constant 0 : index
      %c0_99 = arith.constant 0 : index
      %c0_100 = arith.constant 0 : index
      %205 = vector.load %arg20[%c0_98, %c0_99, %c0_100] : memref<1x1x32xf32, #tpu.memory_space<vmem>>, vector<1x1x32xf32>
      %c0_101 = arith.constant 0 : index
      %c0_102 = arith.constant 0 : index
      %c0_103 = arith.constant 0 : index
      %206 = vector.load %arg21[%c0_101, %c0_102, %c0_103] : memref<1x1x32xf32, #tpu.memory_space<vmem>>, vector<1x1x32xf32>
      %cst_104 = arith.constant dense<0.000000e+00> : vector<2x16xf32>
      %207 = vector.multi_reduction <add>, %200, %cst_104 [2] : vector<2x16x32xf32> to vector<2x16xf32>
      %208 = vector.shape_cast %207 : vector<2x16xf32> to vector<2x16x1xf32>
      %cst_105 = arith.constant 3.200000e+01 : f32
      %209 = vector.broadcast %cst_105 : f32 to vector<2x16x1xf32>
      %210 = arith.divf %208, %209 : vector<2x16x1xf32>
      %211 = vector.broadcast %210 : vector<2x16x1xf32> to vector<2x16x32xf32>
      %212 = arith.subf %200, %211 : vector<2x16x32xf32>
      %213 = arith.mulf %212, %212 : vector<2x16x32xf32>
      %cst_106 = arith.constant dense<0.000000e+00> : vector<2x16xf32>
      %214 = vector.multi_reduction <add>, %213, %cst_106 [2] : vector<2x16x32xf32> to vector<2x16xf32>
      %215 = vector.shape_cast %214 : vector<2x16xf32> to vector<2x16x1xf32>
      %cst_107 = arith.constant 3.200000e+01 : f32
      %216 = vector.broadcast %cst_107 : f32 to vector<2x16x1xf32>
      %217 = arith.divf %215, %216 : vector<2x16x1xf32>
      %218 = vector.broadcast %210 : vector<2x16x1xf32> to vector<2x16x32xf32>
      %219 = arith.subf %200, %218 : vector<2x16x32xf32>
      %cst_108 = arith.constant 9.99999974E-6 : f32
      %220 = vector.broadcast %cst_108 : f32 to vector<2x16x1xf32>
      %221 = arith.addf %217, %220 : vector<2x16x1xf32>
      %222 = math.rsqrt %221 : vector<2x16x1xf32>
      %223 = vector.broadcast %222 : vector<2x16x1xf32> to vector<2x16x32xf32>
      %224 = arith.mulf %219, %223 : vector<2x16x32xf32>
      %225 = vector.broadcast %205 : vector<1x1x32xf32> to vector<2x16x32xf32>
      %226 = arith.mulf %224, %225 : vector<2x16x32xf32>
      %227 = vector.broadcast %206 : vector<1x1x32xf32> to vector<2x16x32xf32>
      %228 = arith.addf %226, %227 : vector<2x16x32xf32>
      %cst_109 = arith.constant dense<0.000000e+00> : vector<2x32xf32>
      %229 = vector.multi_reduction <add>, %228, %cst_109 [1] : vector<2x16x32xf32> to vector<2x32xf32>
      %230 = vector.shape_cast %229 : vector<2x32xf32> to vector<2x1x32xf32>
      %cst_110 = arith.constant 1.600000e+01 : f32
      %231 = vector.broadcast %cst_110 : f32 to vector<2x1x32xf32>
      %232 = arith.divf %230, %231 : vector<2x1x32xf32>
      %c0_111 = arith.constant 0 : index
      %c0_112 = arith.constant 0 : index
      %c0_113 = arith.constant 0 : index
      %233 = vector.load %arg22[%c0_111, %c0_112, %c0_113] : memref<1x1x32xf32, #tpu.memory_space<vmem>>, vector<1x1x32xf32>
      %234 = vector.broadcast %233 : vector<1x1x32xf32> to vector<2x1x32xf32>
      %235 = arith.mulf %232, %234 : vector<2x1x32xf32>
      %cst_114 = arith.constant dense<0.000000e+00> : vector<2x1xf32>
      %236 = vector.multi_reduction <add>, %235, %cst_114 [2] : vector<2x1x32xf32> to vector<2x1xf32>
      %237 = vector.shape_cast %236 : vector<2x1xf32> to vector<2x1x1xf32>
      %c0_115 = arith.constant 0 : index
      %c0_116 = arith.constant 0 : index
      %c0_117 = arith.constant 0 : index
      %238 = vector.load %arg23[%c0_115, %c0_116, %c0_117] : memref<1x1x1xf32, #tpu.memory_space<vmem>>, vector<1x1x1xf32>
      %239 = vector.broadcast %238 : vector<1x1x1xf32> to vector<2x1x1xf32>
      %240 = arith.addf %237, %239 : vector<2x1x1xf32>
      %cst_118 = arith.constant 0.000000e+00 : f32
      %241 = vector.broadcast %cst_118 : f32 to vector<2x1x1xf32>
      %242 = arith.subf %241, %240 : vector<2x1x1xf32>
      %243 = math.exp %242 : vector<2x1x1xf32>
      %cst_119 = arith.constant 1.000000e+00 : f32
      %244 = vector.broadcast %cst_119 : f32 to vector<2x1x1xf32>
      %245 = arith.addf %244, %243 : vector<2x1x1xf32>
      %cst_120 = arith.constant 1.000000e+00 : f32
      %246 = vector.broadcast %cst_120 : f32 to vector<2x1x1xf32>
      %247 = arith.divf %246, %245 : vector<2x1x1xf32>
      %c0_121 = arith.constant 0 : index
      %c0_122 = arith.constant 0 : index
      %c0_123 = arith.constant 0 : index
      %248 = vector.load %arg24[%c0_121, %c0_122, %c0_123] : memref<2x1x1xf32, #tpu.memory_space<vmem>>, vector<2x1x1xf32>
      tpu.vector_store %arg24[%c0_121, %c0_122, %c0_123], %247 {strides = array<i32>} : memref<2x1x1xf32, #tpu.memory_space<vmem>>, vector<2x1x1xf32>,
    } else {
    }
    return
  }
  func.func @transform_0(%arg0: i32, %arg1: i32) -> (i32, i32, i32) {
    %c0_i32 = arith.constant 0 : i32
    %c0_i32_0 = arith.constant 0 : i32
    %c0_i32_1 = arith.constant 0 : i32
    return %arg0, %c0_i32, %c0_i32_0 : i32, i32, i32
  }
  func.func @transform_1(%arg0: i32, %arg1: i32) -> (i32, i32, i32) {
    %c0_i32 = arith.constant 0 : i32
    %c0_i32_0 = arith.constant 0 : i32
    %c0_i32_1 = arith.constant 0 : i32
    %c0_i32_2 = arith.constant 0 : i32
    return %c0_i32, %c0_i32_0, %c0_i32_1 : i32, i32, i32
  }
  func.func @transform_2(%arg0: i32, %arg1: i32) -> (i32, i32, i32) {
    %c0_i32 = arith.constant 0 : i32
    %c0_i32_0 = arith.constant 0 : i32
    %c0_i32_1 = arith.constant 0 : i32
    %c0_i32_2 = arith.constant 0 : i32
    return %c0_i32, %c0_i32_0, %c0_i32_1 : i32, i32, i32
  }
  func.func @transform_3(%arg0: i32, %arg1: i32) -> (i32, i32, i32) {
    %c0_i32 = arith.constant 0 : i32
    %c0_i32_0 = arith.constant 0 : i32
    %c0_i32_1 = arith.constant 0 : i32
    %c0_i32_2 = arith.constant 0 : i32
    return %c0_i32, %c0_i32_0, %c0_i32_1 : i32, i32, i32
  }
  func.func @transform_4(%arg0: i32, %arg1: i32) -> (i32, i32, i32) {
    %c0_i32 = arith.constant 0 : i32
    %c0_i32_0 = arith.constant 0 : i32
    %c0_i32_1 = arith.constant 0 : i32
    %c0_i32_2 = arith.constant 0 : i32
    return %c0_i32, %c0_i32_0, %c0_i32_1 : i32, i32, i32
  }
  func.func @transform_5(%arg0: i32, %arg1: i32) -> (i32, i32, i32) {
    %c0_i32 = arith.constant 0 : i32
    %c0_i32_0 = arith.constant 0 : i32
    %c0_i32_1 = arith.constant 0 : i32
    %c0_i32_2 = arith.constant 0 : i32
    return %c0_i32, %c0_i32_0, %c0_i32_1 : i32, i32, i32
  }
  func.func @transform_6(%arg0: i32, %arg1: i32) -> (i32, i32, i32) {
    %c0_i32 = arith.constant 0 : i32
    %c0_i32_0 = arith.constant 0 : i32
    %c0_i32_1 = arith.constant 0 : i32
    return %arg1, %c0_i32, %c0_i32_0 : i32, i32, i32
  }
  func.func @transform_7(%arg0: i32, %arg1: i32) -> (i32, i32, i32) {
    %c0_i32 = arith.constant 0 : i32
    %c0_i32_0 = arith.constant 0 : i32
    %c0_i32_1 = arith.constant 0 : i32
    return %arg1, %c0_i32, %c0_i32_0 : i32, i32, i32
  }
  func.func @transform_8(%arg0: i32, %arg1: i32) -> (i32, i32, i32, i32) {
    %c0_i32 = arith.constant 0 : i32
    %c0_i32_0 = arith.constant 0 : i32
    %c0_i32_1 = arith.constant 0 : i32
    %c0_i32_2 = arith.constant 0 : i32
    return %arg1, %c0_i32, %c0_i32_0, %c0_i32_1 : i32, i32, i32, i32
  }
  func.func @transform_9(%arg0: i32, %arg1: i32) -> (i32, i32, i32) {
    %c0_i32 = arith.constant 0 : i32
    %c0_i32_0 = arith.constant 0 : i32
    %c0_i32_1 = arith.constant 0 : i32
    return %arg1, %c0_i32, %c0_i32_0 : i32, i32, i32
  }
  func.func @transform_10(%arg0: i32, %arg1: i32) -> (i32, i32, i32, i32) {
    %c0_i32 = arith.constant 0 : i32
    %c0_i32_0 = arith.constant 0 : i32
    %c0_i32_1 = arith.constant 0 : i32
    %c0_i32_2 = arith.constant 0 : i32
    return %arg1, %c0_i32, %c0_i32_0, %c0_i32_1 : i32, i32, i32, i32
  }
  func.func @transform_11(%arg0: i32, %arg1: i32) -> (i32, i32, i32, i32) {
    %c0_i32 = arith.constant 0 : i32
    %c0_i32_0 = arith.constant 0 : i32
    %c0_i32_1 = arith.constant 0 : i32
    %c0_i32_2 = arith.constant 0 : i32
    return %arg1, %c0_i32, %c0_i32_0, %c0_i32_1 : i32, i32, i32, i32
  }
  func.func @transform_12(%arg0: i32, %arg1: i32) -> (i32, i32, i32) {
    %c0_i32 = arith.constant 0 : i32
    %c0_i32_0 = arith.constant 0 : i32
    %c0_i32_1 = arith.constant 0 : i32
    return %arg1, %c0_i32, %c0_i32_0 : i32, i32, i32
  }
  func.func @transform_13(%arg0: i32, %arg1: i32) -> (i32, i32, i32) {
    %c0_i32 = arith.constant 0 : i32
    %c0_i32_0 = arith.constant 0 : i32
    %c0_i32_1 = arith.constant 0 : i32
    return %arg1, %c0_i32, %c0_i32_0 : i32, i32, i32
  }
  func.func @transform_14(%arg0: i32, %arg1: i32) -> (i32, i32, i32) {
    %c0_i32 = arith.constant 0 : i32
    %c0_i32_0 = arith.constant 0 : i32
    %c0_i32_1 = arith.constant 0 : i32
    return %arg1, %c0_i32, %c0_i32_0 : i32, i32, i32
  }
  func.func @transform_15(%arg0: i32, %arg1: i32) -> (i32, i32, i32) {
    %c0_i32 = arith.constant 0 : i32
    %c0_i32_0 = arith.constant 0 : i32
    %c0_i32_1 = arith.constant 0 : i32
    return %arg1, %c0_i32, %c0_i32_0 : i32, i32, i32
  }
  func.func @transform_16(%arg0: i32, %arg1: i32) -> (i32, i32, i32, i32) {
    %c0_i32 = arith.constant 0 : i32
    %c0_i32_0 = arith.constant 0 : i32
    %c0_i32_1 = arith.constant 0 : i32
    %c0_i32_2 = arith.constant 0 : i32
    return %arg1, %c0_i32, %c0_i32_0, %c0_i32_1 : i32, i32, i32, i32
  }
  func.func @transform_17(%arg0: i32, %arg1: i32) -> (i32, i32, i32, i32) {
    %c0_i32 = arith.constant 0 : i32
    %c0_i32_0 = arith.constant 0 : i32
    %c0_i32_1 = arith.constant 0 : i32
    %c0_i32_2 = arith.constant 0 : i32
    return %arg1, %c0_i32, %c0_i32_0, %c0_i32_1 : i32, i32, i32, i32
  }
  func.func @transform_18(%arg0: i32, %arg1: i32) -> (i32, i32, i32) {
    %c0_i32 = arith.constant 0 : i32
    %c0_i32_0 = arith.constant 0 : i32
    %c0_i32_1 = arith.constant 0 : i32
    %c0_i32_2 = arith.constant 0 : i32
    return %c0_i32, %c0_i32_0, %c0_i32_1 : i32, i32, i32
  }
  func.func @transform_19(%arg0: i32, %arg1: i32) -> (i32, i32, i32) {
    %c0_i32 = arith.constant 0 : i32
    %c0_i32_0 = arith.constant 0 : i32
    %c0_i32_1 = arith.constant 0 : i32
    %c0_i32_2 = arith.constant 0 : i32
    return %c0_i32, %c0_i32_0, %c0_i32_1 : i32, i32, i32
  }
  func.func @transform_20(%arg0: i32, %arg1: i32) -> (i32, i32, i32) {
    %c0_i32 = arith.constant 0 : i32
    %c0_i32_0 = arith.constant 0 : i32
    %c0_i32_1 = arith.constant 0 : i32
    %c0_i32_2 = arith.constant 0 : i32
    return %c0_i32, %c0_i32_0, %c0_i32_1 : i32, i32, i32
  }
  func.func @transform_21(%arg0: i32, %arg1: i32) -> (i32, i32, i32) {
    %c0_i32 = arith.constant 0 : i32
    %c0_i32_0 = arith.constant 0 : i32
    %c0_i32_1 = arith.constant 0 : i32
    %c0_i32_2 = arith.constant 0 : i32
    return %c0_i32, %c0_i32_0, %c0_i32_1 : i32, i32, i32
  }
  func.func @transform_22(%arg0: i32, %arg1: i32) -> (i32, i32, i32) {
    %c0_i32 = arith.constant 0 : i32
    %c0_i32_0 = arith.constant 0 : i32
    %c0_i32_1 = arith.constant 0 : i32
    return %arg0, %c0_i32, %c0_i32_0 : i32, i32, i32
  }
}

</mosaic_0001>

<bundles_post_ra>
// kernel: tpu_custom_call.1
= control target key start
LH: loop header
LB: loop body
LE: loop exit
PB: predicated region body
PF: predicated region fallthrough
CT: control target
= control target key end

     0   :  { %s5696_s0 = inlined_call_operand.vmem [shape: f32[2,16,1], index: 0, kind: input, shape index: {}]   ;;  %s5697_s1 = inlined_call_operand.hbm [shape: f32[1,1,32], index: 1, kind: input, shape index: {}]   ;;  %s5698_s2 = inlined_call_operand.hbm [shape: f32[1,1,32], index: 2, kind: input, shape index: {}]   ;;  %s5699_s3 = inlined_call_operand.hbm [shape: f32[1,1,32], index: 3, kind: input, shape index: {}]   ;;  %s5700_s4 = inlined_call_operand.hbm [shape: f32[1,1,32], index: 4, kind: input, shape index: {}]   ;;  %s5701_s5 = inlined_call_operand.vmem [shape: f32[1,16,32], index: 5, kind: input, shape index: {}]   ;;  %s5702_s6 = inlined_call_operand.vmem [shape: f32[2,32,96], index: 6, kind: input, shape index: {}]   ;;  %s5703_s7 = inlined_call_operand.vmem [shape: f32[2,1,96], index: 7, kind: input, shape index: {}]   ;;  %s5704_s8 = inlined_call_operand.vmem [shape: f32[2,4,8,32], index: 8, kind: input, shape index: {}]   ;;  %s5705_s9 = inlined_call_operand.vmem [shape: f32[2,1,32], index: 9, kind: input, shape index: {}]   ;;  %s5706_s10 = inlined_call_operand.vmem [shape: f32[2,1,1,32], index: 10, kind: input, shape index: {}]   ;;  %s5707_s11 = inlined_call_operand.vmem [shape: f32[2,1,1,32], index: 11, kind: input, shape index: {}]   ;;  %s5708_s12 = inlined_call_operand.vmem [shape: f32[2,32,64], index: 12, kind: input, shape index: {}]   ;;  %s5709_s13 = inlined_call_operand.vmem [shape: f32[2,1,64], index: 13, kind: input, shape index: {}]   ;;  %s5710_s14 = inlined_call_operand.vmem [shape: f32[2,64,32], index: 14, kind: input, shape index: {}]   ;;  %s5711_s15 = inlined_call_operand.vmem [shape: f32[2,1,32], index: 15, kind: input, shape index: {}]   ;;  %s5712_s16 = inlined_call_operand.vmem [shape: f32[2,1,1,32], index: 16, kind: input, shape index: {}]   ;;  %s5713_s17 = inlined_call_operand.vmem [shape: f32[2,1,1,32], index: 17, kind: input, shape index: {}]   ;;  %s5714_s18 = inlined_call_operand.vmem [shape: f32[1,1,32], index: 18, kind: input, shape index: {}]   ;;  %s5715_s19 = inlined_call_operand.vmem [shape: f32[1,1,32], index: 19, kind: input, shape index: {}]   ;;  %s5716_s20 = inlined_call_operand.vmem [shape: f32[1,1,32], index: 20, kind: input, shape index: {}]   ;;  %s5717_s21 = inlined_call_operand.<no memory space> [shape: f32[1,1,1], index: 21, kind: input, shape index: {}]   ;;  %s5718_s22 = inlined_call_operand.vmem [shape: f32[2,1,1], index: 22, kind: output, shape index: {}]  }
   0x1   :  { %5734 = sst [smem:[#allocation17_spill]] %s5696_s0  ;;  %v27_v0 = vstv %s5717_s21 }
   0x2   :  { %5735 = sst [smem:[#allocation18_spill]] %s5697_s1  ;;  %28 = vst [vmem:[#allocation3] sm:$0x1] %v27_v0 }
   0x3   :  { %5736 = sst [smem:[#allocation19_spill]] %s5698_s2 }
   0x4   :  { %5737 = sst [smem:[#allocation20_spill]] %s5699_s3 }
   0x5   :  { %5738 = sst [smem:[#allocation21_spill]] %s5700_s4 }
   0x6   :  { %5739 = sst [smem:[#allocation22_spill]] %s5701_s5 }
   0x7   :  { %5740 = sst [smem:[#allocation23_spill]] %s5702_s6 }
   0x8   :  { %5741 = sst [smem:[#allocation24_spill]] %s5704_s8 }
   0x9   :  { %5742 = sst [smem:[#allocation25_spill]] %s5708_s12 }
   0xa   :  { %5743 = sst [smem:[#allocation26_spill]] %s5713_s17 }
   0xb   :  { %5744 = sst [smem:[#allocation27_spill]] %s5714_s18 }
   0xc   :  { %5745 = sst [smem:[#allocation28_spill]] %s5715_s19 }
   0xd   :  { %5746 = sst [smem:[#allocation29_spill]] %s5716_s20 }
   0xe   :  { %5747 = sst [smem:[#allocation30_spill]] %s5718_s22 }
   0xf   :  { %29 = vsyncpa [#allocation5], 0 }
  0x10   :  { %30 = vsyncpa [#allocation7], 0 }
  0x11   :  { %31 = vsyncpa [#allocation10], 0  ;;  %s5134_s29 = smov 0   ;;  %s5136_s30 = smov 0  }
  0x12   :  { %s5138_s4 = smov 0  }
  0x13 LB: > { %5748 = sst [smem:[#allocation14_spill]] %s4994_s30  ;;  %s5000_s21 = smov [#allocation6]   ;;  %s4998_s4 = sphi %s5138_s4, %s37_s4   ;;  %s4994_s30 = sphi %s5136_s30, %s5783_s30   ;;  %s4990_s29 = sphi %s5134_s29, %s5782_s29  }
  0x14   : > { %5749 = sst [smem:[#allocation15_spill]] %s4998_s4  ;;  %s641_s0 = sshll.u32 %s5000_s21, 4  ;;  %s642_s0 = int_to_ptr.vmem [resolvable:$true] %s641_s0 }
  0x15   : > { %s4015_s23 = sadd.s32 4294967295, %s4998_s4   ;;  %p4016_p0 = scmp.ge.s32.totalorder %s4998_s4, 1 }
  0x16   : > { %p607_p1 = scmp.lt.s32.totalorder %s4998_s4, 3  ;;  %p5152_p2 = scmp.eq.s32.totalorder %s4015_s23, 0 }
  0x17   : > { %s46_s24 = sadd.s32 1, %s4994_s30  ;;  %s5001_s26 = smov [#allocation4]  }
  0x18   : > { %s5750_s1 = scalar_select %p5152_p2, 1, 0 }
  0x19   : > { %p5156_p3 = pnand %p4016_p0, %p607_p1  ;;  %p5169_p6 = scmp.ge.s32.totalorder %s46_s24, 2 }
  0x1a   : > { %s630_s2 = sshll.u32 %s5001_s26, 4  ;;  %s5754_s28 = sld [smem:[#allocation19_spill]]  ;;  %s5173_s2 = int_to_ptr.vmem [resolvable:$true] %s630_s2 }
  0x1b   : > { %s5751_s5 = scalar_select %p5156_p3, 1, 0 }
  0x1c   : > { %p4585_p4 = pneg %p5156_p3 }
  0x1d   : > { %s5753_s25 = scalar_select %p5169_p6, 1, 0 }
  0x1e   : > { %p5165_p5 = pnand %p5152_p2, %p4585_p4 }
  0x20   : > { %s4852_s21 = scalar_lea.hbm %s5754_s28, 16  ;;  %p5183_p8 = pneg %p5165_p5 }
  0x21   : > { %p4853_p7 = scmp.ne.s32.totalorder %s5754_s28, %s4852_s21  ;;  %p4859_p11 = scmp.lt.u32.totalorder %s4852_s21, %s5754_s28 }
  0x23   : > { %p4855_p9 = pnand %p5183_p8, %p4853_p7 }
  0x25   : > { %p4856_p10 = pneg %p4855_p9 }
  0x27   : > { %p4861_p12 = pnand %p4859_p11, %p4856_p10 }
  0x29   : > { %4864 = shalt.err (!%p4861_p12)
}
  0x2a   : > { %s4865_s27 = scalar_lea.vmem %s642_s0, 16  ;;  %s4872_s30 = scalar_lea.vmem %s642_s0, 32 }
  0x2b   : > { %p4866_p13 = scmp.ne.s32.totalorder %s642_s0, %s4865_s27  ;;  %p4873_p4 = scmp.lt.s32.totalorder %s642_s0, %s642_s0 }
  0x2c   : > { %p4874_p2 = scmp.lt.s32.totalorder %s4872_s30, %s4865_s27 }
  0x2d   : > { %p4868_p0 = pnand %p4866_p13, %p5183_p8 }
  0x2e   : > { %p4875_p3 = por %p4874_p2, %p4873_p4 }
  0x2f   : > { %p4869_p1 = pneg %p4868_p0 }
  0x31   : > { %p4876_p6 = pnand %p4875_p3, %p4869_p1 }
  0x33   : > { %4879 = shalt.err (!%p4876_p6)
}
  0x34   : > { %4591 = dma.hbm_to_vmem [thread:$0]  (!%p5165_p5), %s5754_s28, 16, %s642_s0, [#allocation7]  }
  0x35   : > { %p5756_p7 = scmp.ne.s32.totalorder %s5753_s25, 0  ;;  %s5758_s26 = sld [smem:[#allocation18_spill]] }
  0x37   : > { %s5785_s24 = smov (%p5756_p7, %s46_s24), 0 }
  0x38   : > { %5757 = sst [smem:[#allocation16_spill]] %s5785_s24 }
  0x3b   : > { %s4880_s20 = scalar_lea.hbm %s5758_s26, 16 }
  0x3c   : > { %p4881_p2 = scmp.ne.s32.totalorder %s5758_s26, %s4880_s20  ;;  %p4887_p9 = scmp.lt.u32.totalorder %s4880_s20, %s5758_s26 }
  0x3e   : > { %p4883_p3 = pnand %p4881_p2, %p5183_p8 }
  0x40   : > { %p4884_p6 = pneg %p4883_p3 }
  0x42   : > { %p4889_p10 = pnand %p4887_p9, %p4884_p6 }
  0x44   : > { %4892 = shalt.err (!%p4889_p10)
}
  0x45   : > { %s4893_s0 = scalar_lea.vmem %s5173_s2, 16  ;;  %s4900_s19 = scalar_lea.vmem %s5173_s2, 32 }
  0x46   : > { %p4894_p11 = scmp.ne.s32.totalorder %s5173_s2, %s4893_s0  ;;  %p4901_p0 = scmp.lt.s32.totalorder %s5173_s2, %s5173_s2 }
  0x47   : > { %p4902_p1 = scmp.lt.s32.totalorder %s4900_s19, %s4893_s0 }
  0x48   : > { %p4896_p12 = pnand %p4894_p11, %p5183_p8 }
  0x49   : > { %p4903_p4 = por %p4902_p1, %p4901_p0 }
  0x4a   : > { %p4897_p13 = pneg %p4896_p12 }
  0x4c   : > { %p4904_p7 = pnand %p4903_p4, %p4897_p13 }
  0x4e   : > { %4907 = shalt.err (!%p4904_p7)
}
  0x4f   : > { %4588 = dma.hbm_to_vmem [thread:$0]  (!%p5165_p5), %s5758_s26, 16, %s5173_s2, [#allocation5]  }
  0x50   : > { %s5002_s25 = smov [#allocation8]   ;;  %s5003_s23 = smov [#allocation9]  }
  0x51   : > { %s652_s3 = sshll.u32 %s5002_s25, 4  ;;  %s663_s22 = sshll.u32 %s5003_s23, 4  ;;  %s653_s3 = int_to_ptr.vmem [resolvable:$true] %s652_s3  ;;  %s664_s22 = int_to_ptr.vmem [resolvable:$true] %s663_s22 }
  0x52   : > { %s5759_s30 = sld [smem:[#allocation20_spill]] }
  0x58   : > { %s5760_s28 = smov %s5759_s30  ;;  %s4908_s0 = scalar_lea.hbm %s5759_s30, 16 }
  0x59   : > { %p4909_p2 = scmp.ne.s32.totalorder %s5760_s28, %s4908_s0  ;;  %p4915_p9 = scmp.lt.u32.totalorder %s4908_s0, %s5760_s28 }
  0x5b   : > { %p4911_p3 = pnand %p4909_p2, %p5183_p8 }
  0x5d   : > { %p4912_p6 = pneg %p4911_p3 }
  0x5f   : > { %p4917_p10 = pnand %p4915_p9, %p4912_p6 }
  0x61   : > { %4920 = shalt.err (!%p4917_p10)
}
  0x62   : > { %s4921_s2 = scalar_lea.vmem %s653_s3, 16  ;;  %s4928_s20 = scalar_lea.vmem %s653_s3, 32 }
  0x63   : > { %p4922_p11 = scmp.ne.s32.totalorder %s653_s3, %s4921_s2  ;;  %p4929_p0 = scmp.lt.s32.totalorder %s653_s3, %s653_s3 }
  0x64   : > { %p4930_p1 = scmp.lt.s32.totalorder %s4928_s20, %s4921_s2 }
  0x65   : > { %p4924_p12 = pnand %p4922_p11, %p5183_p8 }
  0x66   : > { %p4931_p4 = por %p4930_p1, %p4929_p0 }
  0x67   : > { %p4925_p13 = pneg %p4924_p12 }
  0x69   : > { %p4932_p7 = pnand %p4931_p4, %p4925_p13 }
  0x6b   : > { %4935 = shalt.err (!%p4932_p7)
}
  0x6c   : > { %4594 = dma.hbm_to_vmem [thread:$0]  (!%p5165_p5), %s5760_s28, 16, %s653_s3, [#allocation7]  }
  0x6d   : > { %s5761_s21 = sld [smem:[#allocation21_spill]] }
  0x73   : > { %s4936_s27 = scalar_lea.hbm %s5761_s21, 16 }
  0x74   : > { %p4937_p2 = scmp.ne.s32.totalorder %s5761_s21, %s4936_s27  ;;  %p4943_p9 = scmp.lt.u32.totalorder %s4936_s27, %s5761_s21 }
  0x76   : > { %p4939_p3 = pnand %p4937_p2, %p5183_p8 }
  0x78   : > { %p4940_p6 = pneg %p4939_p3 }
  0x7a   : > { %p4945_p10 = pnand %p4943_p9, %p4940_p6 }
  0x7c   : > { %4948 = shalt.err (!%p4945_p10)
}
  0x7d   : > { %s4949_s2 = scalar_lea.vmem %s664_s22, 16  ;;  %s4956_s3 = scalar_lea.vmem %s664_s22, 32 }
  0x7e   : > { %p4950_p11 = scmp.ne.s32.totalorder %s664_s22, %s4949_s2  ;;  %p4957_p0 = scmp.lt.s32.totalorder %s664_s22, %s664_s22 }
  0x7f   : > { %p4958_p1 = scmp.lt.s32.totalorder %s4956_s3, %s4949_s2 }
  0x80   : > { %p4952_p12 = pnand %p4950_p11, %p5183_p8 }
  0x81   : > { %p4959_p4 = por %p4958_p1, %p4957_p0 }
  0x82   : > { %p4953_p13 = pneg %p4952_p12 }
  0x84   : > { %p4960_p7 = pnand %p4959_p4, %p4953_p13 }
  0x86   : > { %4963 = shalt.err (!%p4960_p7)
}
  0x87   : > { %4597 = dma.hbm_to_vmem [thread:$0]  (!%p5165_p5), %s5761_s21, 16, %s664_s22, [#allocation10]  }
  0x88   : > { %p5762_p2 = scmp.ne.s32.totalorder %s5751_s5, 0 }
  0x89   : > { %p5763_p3 = scmp.ne.s32.totalorder (!%p5762_p2), %s5750_s1, 0 }
  0x8a   : > { %771 = sbr.rel (%p5762_p2) target bundleno = 5406 (0x151e), region = 108 }
  0x91   : > { %4977 = dma.done.wait (%p5763_p3), [#allocation5], 16  }
  0x92   : > { %4979 = vsyncadd (%p5763_p3), [#allocation5], 4294967280 }
  0x93   : > { %4981 = dma.done.wait (%p5763_p3), [#allocation7], 32  }
  0x94   : > { %4983 = vsyncadd (%p5763_p3), [#allocation7], 4294967264 }
  0x95   : > { %4985 = dma.done.wait (%p5763_p3), [#allocation10], 16  }
  0x96   : > { %4987 = vsyncadd (%p5763_p3), [#allocation10], 4294967280  ;;  %p896_p5 = scmp.lt.s32.totalorder %s4990_s29, 1  ;;  %s5764_s23 = sld [smem:[#allocation23_spill]] }
  0x97   : > { %s5765_s8 = sld [smem:[#allocation24_spill]]  ;;  %s5766_s12 = sld [smem:[#allocation25_spill]] }
  0x98   : > { %s5279_s4 = scalar_select %p896_p5, %s4990_s29, 1 }
  0x99   : > { %s5767_s21 = sld [smem:[#allocation26_spill]]  ;;  %p4036_p8 = scmp.ne.s32.totalorder %s4990_s29, 0 }
  0x9a   : > { %s4135_s5 = sshll.u32 %s5279_s4, 5  ;;  %s4138_s26 = sshll.u32 %s5279_s4, 6  ;;  %v5004_v3 = vmov (!%p4036_p8), 0   ;;  %v4037_v6 = vld [vmem:[#allocation4] ss:$0 sm:$0xff] (!%p4036_p8)  ;;  %vm997_vm0 = vcmask (!%p4036_p8), 261120  }
  0x9b   : > { %s5321_s3 = scalar_lea.vmem %s5710_s14, %s4138_s26  ;;  %s933_s6 = scalar_lea.vmem %s5711_s15, %s5279_s4  ;;  %4647 = vset.pattern.permute.xlu1 (!%p4036_p8), %v5004_v3  ;;  %4646 = vset.pattern.permute.xlu0 (!%p4036_p8), %v5004_v3  ;;  %v4038_v9 = vld [vmem:[#allocation6] ss:$0 sm:$0xff] (!%p4036_p8)  ;;  %v4039_v57 = vld [vmem:[#allocation8] ss:$0 sm:$0xff] (!%p4036_p8)  ;;  %v4040_v59 = vld [vmem:[#allocation9] ss:$0 sm:$0xff] (!%p4036_p8) }
  0x9c   : > { %s5289_s27 = scalar_lea.vmem %s5764_s23, %s4135_s5  ;;  %s936_s25 = scalar_lea.vmem %s5712_s16, %s5279_s4 }
  0x9d   : > { %s5294_s19 = scalar_lea.vmem %s5765_s8, %s4135_s5  ;;  %s5311_s23 = scalar_lea.vmem %s5766_s12, %s4135_s5 }
  0x9e   : > { %s925_s8 = scalar_lea.vmem %s5709_s13, %s5279_s4  ;;  %948 = sbr.rel (%p4036_p8) target bundleno = 647 (0x287), region = 128 }
  0x9f   : > { %s939_s12 = scalar_lea.vmem %s5767_s21, %s5279_s4  ;;  %s5768_s18 = sld [smem:[#allocation17_spill]] (!%p4036_p8) }
  0xa0   : > { %s5769_s17 = sld [smem:[#allocation22_spill]] (!%p4036_p8) }
  0xa5   : > { %v951_v1 = vld [vmem:[%s5768_s18 + $0x10] sm:$0xff]  ;;  %v949_v2 = vld [vmem:[%s5768_s18] sm:$0xff]  ;;  %v952_v4 = vld [vmem:[%s5768_s18 + $0x18] sm:$0xff] }
  0xa6   : > { %966 = vperm.xlu1 %4647, %v951_v1   ;;  %956 = vperm.xlu0 %4646, %v949_v2   ;;  %v950_v5 = vld [vmem:[%s5768_s18 + $0x8] sm:$0xff] }
  0xaa   : > { %971 = vperm.xlu1 %4647, %v952_v4   ;;  %961 = vperm.xlu0 %4646, %v950_v5  }
 0x125   : > { %v967_v7 = vpop.permute.xlu1 %966  ;;  %v957_v8 = vpop.permute.xlu0 %956 }
 0x126   : > { %v982_v10 = vmul.f32 %v4037_v6, %v967_v7  ;;  %v980_v11 = vmul.f32 %v4037_v6, %v957_v8 }
 0x128   : > { %v991_v12 = vadd.f32 %v4038_v9, %v980_v11  ;;  %v993_v13 = vadd.f32 %v4038_v9, %v982_v10 }
 0x129   : > { %v972_v14 = vpop.permute.xlu1 %971  ;;  %v962_v15 = vpop.permute.xlu0 %961 }
 0x12a   : > { %v983_v16 = vmul.f32 %v4037_v6, %v972_v14  ;;  %v981_v17 = vmul.f32 %v4037_v6, %v962_v15  ;;  %v998_v18 = vsel %vm997_vm0, %v991_v12, 0.0  ;;  %v1004_v19 = vsel %vm997_vm0, %v993_v13, 0.0 }
 0x12b   : > { %999 = vadd.xlane.f32.xlu0 %v998_v18 }
 0x12c   : > { %v992_v20 = vadd.f32 %v4038_v9, %v981_v17  ;;  %v994_v22 = vadd.f32 %v4038_v9, %v983_v16 }
 0x12e   : > { %v1001_v21 = vsel %vm997_vm0, %v992_v20, 0.0  ;;  %v1007_v23 = vsel %vm997_vm0, %v994_v22, 0.0 }
 0x12f   : > { %1005 = vadd.xlane.f32.xlu0 %v1004_v19  ;;  %1002 = vadd.xlane.f32.xlu1 %v1001_v21 }
 0x133   : > { %1008 = vadd.xlane.f32.xlu0 %v1007_v23 }
 0x1b8   : > { %v1000_v24 = vpop.xlane.xlu0 %999 }
 0x1b9   : > { %v1011_v25 = vmul.f32 0.03125, %v1000_v24 }
 0x1bb   : > { %v1015_v26 = vsub.f32 %v991_v12, %v1011_v25 }
 0x1bc   : > { %v1003_v27 = vpop.xlane.xlu1 %1002  ;;  %v1006_v28 = vpop.xlane.xlu0 %1005 }
 0x1bd   : > { %v1012_v29 = vmul.f32 0.03125, %v1003_v27  ;;  %v1013_v30 = vmul.f32 0.03125, %v1006_v28  ;;  %v1019_v31 = vmul.f32 %v1015_v26, %v1015_v26 }
 0x1bf   : > { %v1016_v32 = vsub.f32 %v992_v20, %v1012_v29  ;;  %v1017_v33 = vsub.f32 %v993_v13, %v1013_v30  ;;  %v1023_v34 = vsel %vm997_vm0, %v1019_v31, 0.0 }
 0x1c0   : > { %1024 = vadd.xlane.f32.xlu1 %v1023_v34  ;;  %v1009_v35 = vpop.xlane.xlu0 %1008 }
 0x1c1   : > { %v1014_v36 = vmul.f32 0.03125, %v1009_v35  ;;  %v1020_v37 = vmul.f32 %v1016_v32, %v1016_v32  ;;  %v1021_v38 = vmul.f32 %v1017_v33, %v1017_v33 }
 0x1c3   : > { %v1018_v39 = vsub.f32 %v994_v22, %v1014_v36  ;;  %v1026_v40 = vsel %vm997_vm0, %v1020_v37, 0.0  ;;  %v1029_v41 = vsel %vm997_vm0, %v1021_v38, 0.0 }
 0x1c4   : > { %1027 = vadd.xlane.f32.xlu0 %v1026_v40  ;;  %1030 = vadd.xlane.f32.xlu1 %v1029_v41 }
 0x1c5   : > { %v1022_v42 = vmul.f32 %v1018_v39, %v1018_v39 }
 0x1c7   : > { %v1032_v43 = vsel %vm997_vm0, %v1022_v42, 0.0 }
 0x1c8   : > { %1033 = vadd.xlane.f32.xlu0 %v1032_v43  ;;  %v1108_v43 = vld [vmem:[%s5769_s17 + $0x8] sm:$0xff] }
 0x24d   : > { %v1025_v44 = vpop.xlane.xlu1 %1024 }
 0x24e   : > { %v1035_v45 = vmul.f32 0.03125, %v1025_v44 }
 0x250   : > { %v1039_v46 = vadd.f32 1e-05, %v1035_v45 }
 0x251   : > { %v1031_v47 = vpop.xlane.xlu1 %1030  ;;  %v1028_v48 = vpop.xlane.xlu0 %1027 }
 0x252   : > { %4648 = vrsqrt.f32 %v1039_v46  ;;  %v1037_v49 = vmul.f32 0.03125, %v1031_v47  ;;  %v1036_v50 = vmul.f32 0.03125, %v1028_v48 }
 0x254   : > { %v1041_v51 = vadd.f32 1e-05, %v1037_v49  ;;  %v1040_v52 = vadd.f32 1e-05, %v1036_v50 }
 0x255   : > { %v1034_v53 = vpop.xlane.xlu0 %1033 }
 0x256   : > { %4650 = vrsqrt.f32 %v1041_v51  ;;  %v1038_v54 = vmul.f32 0.03125, %v1034_v53 }
 0x257   : > { %4652 = vrsqrt.f32 %v1040_v52 }
 0x258   : > { %v1042_v55 = vadd.f32 1e-05, %v1038_v54 }
 0x25a   : > { %4654 = vrsqrt.f32 %v1042_v55 }
 0x25c   : > { %v4649_v56 = vpop.eup %4648 }
 0x25d   : > { %v1047_v58 = vmul.f32 %v4649_v56, %v1015_v26 }
 0x25f   : > { %v1057_v60 = vmul.f32 %v4039_v57, %v1047_v58 }
 0x260   : > { %v4651_v61 = vpop.eup %4650 }
 0x261   : > { %v4653_v62 = vpop.eup %4652  ;;  %v1067_v63 = vadd.f32 %v4040_v59, %v1057_v60  ;;  %v1049_v0 = vmul.f32 %v4651_v61, %v1017_v33  ;;  %v1107_v33 = vld [vmem:[%s5769_s17] sm:$0xff] }
 0x262   : > { %v1048_v1 = vmul.f32 %v4653_v62, %v1016_v32 }
 0x263   : > { %v1075_v2 = vmul.f32 0.044715, %v1067_v63  ;;  %v1059_v3 = vmul.f32 %v4039_v57, %v1049_v0  ;;  %v1071_v31 = vmul.f32 0.5, %v1067_v63 }
 0x264   : > { %v4655_v4 = vpop.eup %4654  ;;  %v1058_v5 = vmul.f32 %v4039_v57, %v1048_v1 }
 0x265   : > { %v1079_v6 = vmul.f32 %v1075_v2, %v1067_v63  ;;  %v1069_v7 = vadd.f32 %v4040_v59, %v1059_v3  ;;  %v1050_v8 = vmul.f32 %v4655_v4, %v1018_v39 }
 0x266   : > { %v1068_v9 = vadd.f32 %v4040_v59, %v1058_v5 }
 0x267   : > { %v1083_v10 = vmul.f32 %v1079_v6, %v1067_v63  ;;  %v1077_v11 = vmul.f32 0.044715, %v1069_v7  ;;  %v1060_v12 = vmul.f32 %v4039_v57, %v1050_v8  ;;  %v1073_v38 = vmul.f32 0.5, %v1069_v7 }
 0x268   : > { %v1076_v13 = vmul.f32 0.044715, %v1068_v9  ;;  %v1072_v40 = vmul.f32 0.5, %v1068_v9 }
 0x269   : > { %v1087_v14 = vadd.f32 %v1083_v10, %v1067_v63  ;;  %v1081_v15 = vmul.f32 %v1077_v11, %v1069_v7  ;;  %v1070_v16 = vadd.f32 %v4040_v59, %v1060_v12 }
 0x26a   : > { %v1080_v17 = vmul.f32 %v1076_v13, %v1068_v9 }
 0x26b   : > { %v1091_v18 = vmul.f32 0.7978846, %v1087_v14  ;;  %v1085_v19 = vmul.f32 %v1081_v15, %v1069_v7  ;;  %v1078_v20 = vmul.f32 0.044715, %v1070_v16  ;;  %v1074_v47 = vmul.f32 0.5, %v1070_v16 }
 0x26c   : > { %v1084_v21 = vmul.f32 %v1080_v17, %v1068_v9 }
 0x26d   : > { %4656 = vtanh.f32 %v1091_v18  ;;  %v1089_v22 = vadd.f32 %v1085_v19, %v1069_v7  ;;  %v1082_v23 = vmul.f32 %v1078_v20, %v1070_v16 }
 0x26e   : > { %v1088_v24 = vadd.f32 %v1084_v21, %v1068_v9 }
 0x26f   : > { %v1093_v25 = vmul.f32 0.7978846, %v1089_v22  ;;  %v1086_v26 = vmul.f32 %v1082_v23, %v1070_v16 }
 0x270   : > { %v1092_v27 = vmul.f32 0.7978846, %v1088_v24 }
 0x271   : > { %4658 = vtanh.f32 %v1093_v25  ;;  %v1090_v28 = vadd.f32 %v1086_v26, %v1070_v16 }
 0x272   : > { %4660 = vtanh.f32 %v1092_v27 }
 0x273   : > { %v1094_v29 = vmul.f32 0.7978846, %v1090_v28 }
 0x275   : > { %4662 = vtanh.f32 %v1094_v29 }
 0x277   : > { %v4657_v30 = vpop.eup %4656 }
 0x278   : > { %v1099_v32 = vadd.f32 1.0, %v4657_v30 }
 0x27a   : > { %v1103_v34 = vmul.f32 %v1099_v32, %v1071_v31 }
 0x27b   : > { %v4659_v35 = vpop.eup %4658 }
 0x27c   : > { %v4661_v36 = vpop.eup %4660  ;;  %v1109_v37 = vadd.f32 %v1107_v33, %v1103_v34  ;;  %v1101_v39 = vadd.f32 1.0, %v4659_v35 }
 0x27d   : > { %v1100_v41 = vadd.f32 1.0, %v4661_v36 }
 0x27e   : > { %1113 = vst.msk [vmem:[#allocation2] sm:$0xff] %vm997_vm0, %v1109_v37  ;;  %v1105_v42 = vmul.f32 %v1101_v39, %v1073_v38 }
 0x27f   : > { %v4663_v44 = vpop.eup %4662  ;;  %v1104_v45 = vmul.f32 %v1100_v41, %v1072_v40 }
 0x280   : > { %v1111_v46 = vadd.f32 %v1107_v33, %v1105_v42  ;;  %v1102_v48 = vadd.f32 1.0, %v4663_v44 }
 0x281   : > { %v1110_v49 = vadd.f32 %v1108_v43, %v1104_v45 }
 0x282   : > { %1115 = vst.msk [vmem:[#allocation2 + $0x10] sm:$0xff] %vm997_vm0, %v1111_v46  ;;  %v1106_v50 = vmul.f32 %v1102_v48, %v1074_v47 }
 0x283   : > { %1114 = vst.msk [vmem:[#allocation2 + $0x8] sm:$0xff] %vm997_vm0, %v1110_v49 }
 0x284   : > { %v1112_v51 = vadd.f32 %v1108_v43, %v1106_v50 }
 0x286   : > { %1116 = vst.msk [vmem:[#allocation2 + $0x18] sm:$0xff] %vm997_vm0, %v1112_v51 }
 0x287 PF: > { %v1117_v52 = vld [vmem:[#allocation2] sm:$0xff]  ;;  %vm1123_vm1 = vcmask 261120   ;;  %v1198_v17 = vld [vmem:[%s5289_s27 + $0x8] sm:$0xff]  ;;  %v1199_v18 = vld [vmem:[%s5289_s27 + $0x10] sm:$0xff]  ;;  %s5770_s2 = scalar_lea.vmem %s5706_s10, %s5279_s4  ;;  %s5771_s21 = scalar_lea.vmem %s5707_s11, %s5279_s4  ;;  %vm1315_vm2 = vcmask 64512   ;;  %vm1492_vm4 = vcmask 130048  }
 0x288   : > { %v1124_v55 = vsel %vm1123_vm1, %v1117_v52, 0.0  ;;  %v1197_v16 = vld [vmem:[%s5289_s27] sm:$0xff]  ;;  %v1200_v20 = vld [vmem:[%s5289_s27 + $0x18] sm:$0xff]  ;;  %s5772_s5 = scalar_lea.vmem %s5703_s7, %s5279_s4  ;;  %s5005_s30 = smov 96   ;;  %vm5413_vm3 = vmpackc.low %vm1315_vm2, %vm1315_vm2  ;;  %vm3488_vm5 = vcmask 523264  }
 0x289   : > { %v1119_v53 = vld [vmem:[#allocation2 + $0x10] sm:$0xff]  ;;  %1125 = vadd.xlane.f32.xlu0 %v1124_v55  ;;  %v4445_v19 = vpack.c.bf16 %v1198_v17, %v1197_v16  ;;  %v4449_v21 = vpack.c.bf16 %v1200_v20, %v1199_v18  ;;  %v4041_v35 = vld [vmem:[%s5770_s2] ss:$0 sm:$0xff]  ;;  %s5006_s0 = smov 64   ;;  %s5007_s27 = smov 88  }
 0x28a   : > { %v1118_v54 = vld [vmem:[#allocation2 + $0x8] sm:$0xff]  ;;  %v1130_v56 = vsel %vm1123_vm1, %v1119_v53, 0.0  ;;  %v4042_v37 = vld [vmem:[%s5771_s21] ss:$0 sm:$0xff]  ;;  %s5008_s26 = smov 120   ;;  %s5009_s2 = smov 80  }
 0x28b   : > { %1131 = vadd.xlane.f32.xlu1 %v1130_v56  ;;  %v1127_v58 = vsel %vm1123_vm1, %v1118_v54, 0.0  ;;  %4446 = vmatprep.subr.bf16.mxu1 %v4445_v19  ;;  %s5010_s1 = smov 112   ;;  %s5011_s20 = smov 56  }
 0x28c   : > { %4448 = vmatpush3.bf16.msra.mxu1 %v4445_v19  ;;  %s5012_s21 = smov 48   ;;  %s5013_s24 = smov 104  }
 0x28d   : > { %v1120_v57 = vld [vmem:[#allocation2 + $0x18] sm:$0xff]  ;;  %1128 = vadd.xlane.f32.xlu0 %v1127_v58  ;;  %4450 = vmatprep.subr.bf16.mxu1 %v4449_v21  ;;  %s5014_s22 = smov 72   ;;  %p4128_p6 = scmp.ne.s32.totalorder %s4990_s29, 1 }
 0x28e   : > { %v1133_v59 = vsel %vm1123_vm1, %v1120_v57, 0.0  ;;  %vm3770_vm6 = vcmask (!%p4128_p6), 253952   ;;  %vm3792_vm7 = vcmask (!%p4128_p6), 0  }
 0x28f   : > { %1134 = vadd.xlane.f32.xlu1 %v1133_v59 }
 0x290   : > { %4452 = vmatpush3.bf16.msra.mxu1 %v4449_v21 }
 0x316   : > { %v1126_v60 = vpop.xlane.xlu0 %1125 }
 0x317   : > { %v1137_v62 = vmul.f32 0.03125, %v1126_v60 }
 0x318   : > { %v1132_v61 = vpop.xlane.xlu1 %1131 }
 0x319   : > { %v1139_v63 = vmul.f32 0.03125, %v1132_v61  ;;  %v1141_v0 = vsub.f32 %v1117_v52, %v1137_v62  ;;  %v4043_v52 = vld [vmem:[%s5772_s5] ss:$0 sm:$0xff]  ;;  %s5015_s5 = smov 40  }
 0x31a   : > { %v1129_v2 = vpop.xlane.xlu0 %1128 }
 0x31b   : > { %v1143_v1 = vsub.f32 %v1119_v53, %v1139_v63  ;;  %v1138_v4 = vmul.f32 0.03125, %v1129_v2  ;;  %v1145_v6 = vmul.f32 %v1141_v0, %v1141_v0 }
 0x31c   : > { %v1135_v3 = vpop.xlane.xlu1 %1134 }
 0x31d   : > { %v1140_v5 = vmul.f32 0.03125, %v1135_v3  ;;  %v1147_v7 = vmul.f32 %v1143_v1, %v1143_v1  ;;  %v1142_v8 = vsub.f32 %v1118_v54, %v1138_v4  ;;  %v1149_v10 = vsel %vm1123_vm1, %v1145_v6, 0.0 }
 0x31e   : > { %1150 = vadd.xlane.f32.xlu0 %v1149_v10 }
 0x31f   : > { %v1144_v9 = vsub.f32 %v1120_v57, %v1140_v5  ;;  %v1155_v11 = vsel %vm1123_vm1, %v1147_v7, 0.0  ;;  %v1146_v12 = vmul.f32 %v1142_v8, %v1142_v8 }
 0x321   : > { %v1148_v13 = vmul.f32 %v1144_v9, %v1144_v9  ;;  %v1152_v14 = vsel %vm1123_vm1, %v1146_v12, 0.0 }
 0x322   : > { %1156 = vadd.xlane.f32.xlu0 %v1155_v11  ;;  %1153 = vadd.xlane.f32.xlu1 %v1152_v14 }
 0x323   : > { %v1158_v15 = vsel %vm1123_vm1, %v1148_v13, 0.0 }
 0x326   : > { %1159 = vadd.xlane.f32.xlu1 %v1158_v15 }
 0x3ab   : > { %v1151_v22 = vpop.xlane.xlu0 %1150 }
 0x3ac   : > { %v1161_v23 = vmul.f32 0.03125, %v1151_v22 }
 0x3ae   : > { %v1165_v24 = vadd.f32 1e-05, %v1161_v23 }
 0x3af   : > { %v1154_v25 = vpop.xlane.xlu1 %1153  ;;  %v1157_v26 = vpop.xlane.xlu0 %1156 }
 0x3b0   : > { %4744 = vrsqrt.f32 %v1165_v24  ;;  %v1162_v27 = vmul.f32 0.03125, %v1154_v25  ;;  %v1163_v28 = vmul.f32 0.03125, %v1157_v26 }
 0x3b2   : > { %v1166_v29 = vadd.f32 1e-05, %v1162_v27  ;;  %v1167_v30 = vadd.f32 1e-05, %v1163_v28 }
 0x3b3   : > { %v1160_v31 = vpop.xlane.xlu1 %1159 }
 0x3b4   : > { %4746 = vrsqrt.f32 %v1166_v29  ;;  %v1164_v32 = vmul.f32 0.03125, %v1160_v31 }
 0x3b5   : > { %4748 = vrsqrt.f32 %v1167_v30 }
 0x3b6   : > { %v1168_v33 = vadd.f32 1e-05, %v1164_v32 }
 0x3b8   : > { %4750 = vrsqrt.f32 %v1168_v33 }
 0x3ba   : > { %v4745_v34 = vpop.eup %4744 }
 0x3bb   : > { %v1173_v36 = vmul.f32 %v4745_v34, %v1141_v0 }
 0x3bd   : > { %v1183_v38 = vmul.f32 %v4041_v35, %v1173_v36 }
 0x3be   : > { %v4747_v39 = vpop.eup %4746 }
 0x3bf   : > { %v4749_v40 = vpop.eup %4748  ;;  %v1193_v41 = vadd.f32 %v4042_v37, %v1183_v38  ;;  %v1174_v42 = vmul.f32 %v4747_v39, %v1142_v8 }
 0x3c0   : > { %v1175_v43 = vmul.f32 %v4749_v40, %v1143_v1 }
 0x3c1   : > { %4259 = vmatprep.mubr.msk.f32.mxu1 %vm1123_vm1, %v1193_v41  ;;  %v1184_v44 = vmul.f32 %v4041_v35, %v1174_v42 }
 0x3c2   : > { %v4751_v45 = vpop.eup %4750  ;;  %v1185_v46 = vmul.f32 %v4041_v35, %v1175_v43 }
 0x3c3   : > { %v1194_v47 = vadd.f32 %v4042_v37, %v1184_v44  ;;  %v1176_v48 = vmul.f32 %v4751_v45, %v1144_v9 }
 0x3c4   : > { %v1195_v49 = vadd.f32 %v4042_v37, %v1185_v46 }
 0x3c5   : > { %4260 = vmatmul.mubr.msk.f32.vlgmr.msra.gmra.mrb[0].mxu1 %vm1123_vm1, %v1194_v47  ;;  %v1186_v50 = vmul.f32 %v4041_v35, %v1176_v48 }
 0x3c6   : > { %4262 = vmatprep.mubr.msk.f32.mxu1 %vm1123_vm1, %v1195_v49 }
 0x3c7   : > { %v1196_v51 = vadd.f32 %v4042_v37, %v1186_v50 }
 0x3c9   : > { %4263 = vmatmul.mubr.msk.f32.gmra.mrb[2].mxu1 %vm1123_vm1, %v1196_v51 }
 0x498   : > { %v4261_v53 = vpop.f32.mrb[0].mxu1 }
 0x499   : > { %v1292_v54 = vadd.f32 %v4261_v53, %v4043_v52  ;;  %v1286_v55 = vpop.f32.mrb[1].mxu1 }
 0x49a   : > { %v1287_v56 = vadd.f32 %v4043_v52, %v1286_v55 }
 0x49b   : > { %v5425_v10 = vmul.f32 0.35355338, %v1292_v54 }
 0x49c   : > { %v4264_v57 = vpop.f32.mrb[2].mxu1  ;;  %v5397_v58 = vpack.i.bf16 %v1292_v54, %v1287_v56  ;;  %v5399_v59 = vmul.f32 0.35355338, %v1287_v56 }
 0x49d   : > { %v1302_v60 = vadd.f32 %v4264_v57, %v4043_v52  ;;  %v1296_v61 = vpop.f32.mrb[3].mxu1 }
 0x49e   : > { %v1297_v62 = vadd.f32 %v4043_v52, %v1296_v61  ;;  %4665 = vrot.lane.b32.xlu0 %v5397_v58, %s5005_s30  ;;  %4269 = vmatprep.mubr.msk.f32.mxu1 %vm1315_vm2, %v5399_v59 }
 0x49f   : > { %v5429_v11 = vmul.f32 0.35355338, %v1302_v60 }
 0x4a0   : > { %v5404_v63 = vpack.i.bf16 %v1302_v60, %v1297_v62  ;;  %v5406_v0 = vmul.f32 0.35355338, %v1297_v62 }
 0x4a2   : > { %4670 = vrot.lane.b32.xlu1 %v5404_v63, %s5005_s30  ;;  %4276 = vmatprep.mubr.msk.f32.mxu0 %vm1315_vm2, %v5406_v0 }
 0x510   : > { %v4666_v1 = vpop.permute.xlu0 %4665 }
 0x511   : > { %v4668_v2 = vunpack.i.h.bf16 %v4666_v1  ;;  %v4667_v3 = vunpack.i.l.bf16 %v4666_v1 }
 0x513   : > { %v4453_v5 = vpack.c.bf16 %v4668_v2, %v4667_v3 }
 0x514   : > { %v4671_v6 = vpop.permute.xlu1 %4670 }
 0x515   : > { %v4673_v7 = vunpack.i.h.bf16 %v4671_v6  ;;  %v4672_v8 = vunpack.i.l.bf16 %v4671_v6  ;;  %4455 = vmatprep.subr.msk.bf16.mxu1 %vm5413_vm3, %v4453_v5 }
 0x516   : > { %4458 = vmatpush3.bf16.xpose.msk.msra.mxu1 %vm5413_vm3, %v4453_v5 }
 0x517   : > { %v4459_v9 = vpack.c.bf16 %v4673_v7, %v4672_v8 }
 0x519   : > { %4461 = vmatprep.subr.msk.bf16.mxu0 %vm5413_vm3, %v4459_v9 }
 0x51a   : > { %4464 = vmatpush3.bf16.xpose.msk.msra.mxu0 %vm5413_vm3, %v4459_v9 }
 0x51d   : > { %4270 = vmatmul.mubr.msk.f32.vlgmr.msra.gmra.mrb[4].mxu1 %vm1315_vm2, %v5425_v10 }
 0x521   : > { %4277 = vmatmul.mubr.msk.f32.vlgmr.msra.gmra.mrb[0].mxu0 %vm1315_vm2, %v5429_v11 }
 0x5f0   : > { %v4271_v12 = vpop.f32.mrb[4].mxu1 }
 0x5f1   : > { %v1392_v13 = vpop.f32.mrb[5].mxu1  ;;  %v1496_v14 = vsel %vm1492_vm4, %v4271_v12, -inf }
 0x5f2   : > { %1497 = vmax.xlane.f32.xlu0 %v1496_v14  ;;  %v1493_v15 = vsel %vm1492_vm4, %v1392_v13, -inf }
 0x5f3   : > { %1494 = vmax.xlane.f32.xlu1 %v1493_v15 }
 0x5f4   : > { %v4278_v16 = vpop.f32.mrb[0].mxu0 }
 0x5f5   : > { %v1483_v17 = vpop.f32.mrb[1].mxu0  ;;  %v1502_v18 = vsel %vm1492_vm4, %v4278_v16, -inf }
 0x5f6   : > { %v1499_v19 = vsel %vm1492_vm4, %v1483_v17, -inf }
 0x5f7   : > { %1500 = vmax.xlane.f32.xlu0 %v1499_v19  ;;  %1503 = vmax.xlane.f32.xlu1 %v1502_v18 }
 0x67f   : > { %v1498_v20 = vpop.xlane.xlu0 %1497 }
 0x680   : > { %v1506_v21 = vsub.f32 %v4271_v12, %v1498_v20  ;;  %v1495_v22 = vpop.xlane.xlu1 %1494 }
 0x681   : > { %v1505_v23 = vsub.f32 %v1392_v13, %v1495_v22 }
 0x682   : > { %v1511_v24 = vmul.f32 1.442695, %v1506_v21 }
 0x683   : > { %v1509_v25 = vmul.f32 1.442695, %v1505_v23 }
 0x684   : > { %4752 = vpow2.f32 %v1511_v24  ;;  %v1501_v26 = vpop.xlane.xlu0 %1500  ;;  %v1504_v27 = vpop.xlane.xlu1 %1503 }
 0x685   : > { %4754 = vpow2.f32 %v1509_v25  ;;  %v1507_v28 = vsub.f32 %v1483_v17, %v1501_v26  ;;  %v1508_v29 = vsub.f32 %v4278_v16, %v1504_v27 }
 0x687   : > { %v1513_v30 = vmul.f32 1.442695, %v1507_v28  ;;  %v1515_v31 = vmul.f32 1.442695, %v1508_v29 }
 0x689   : > { %4756 = vpow2.f32 %v1513_v30 }
 0x68a   : > { %4758 = vpow2.f32 %v1515_v31 }
 0x68e   : > { %v4753_v32 = vpop.eup %4752 }
 0x68f   : > { %v4755_v33 = vpop.eup %4754  ;;  %v1520_v34 = vsel %vm1492_vm4, %v4753_v32, 0.0 }
 0x690   : > { %1521 = vadd.xlane.f32.xlu1 %v1520_v34  ;;  %v1517_v35 = vsel %vm1492_vm4, %v4755_v33, 0.0 }
 0x691   : > { %1518 = vadd.xlane.f32.xlu0 %v1517_v35 }
 0x693   : > { %v4757_v36 = vpop.eup %4756 }
 0x694   : > { %v4759_v37 = vpop.eup %4758  ;;  %v1523_v38 = vsel %vm1492_vm4, %v4757_v36, 0.0 }
 0x695   : > { %1524 = vadd.xlane.f32.xlu0 %v1523_v38  ;;  %v1526_v39 = vsel %vm1492_vm4, %v4759_v37, 0.0 }
 0x696   : > { %1527 = vadd.xlane.f32.xlu1 %v1526_v39 }
 0x6a7   : > { %4680 = vrot.lane.b32.xlu1 %v5404_v63, %s5006_s0 }
 0x6ab   : > { %4685 = vrot.lane.b32.xlu1 %v5404_v63, %s5007_s27  ;;  %4675 = vrot.lane.b32.xlu0 %v5397_v58, %s5006_s0  ;;  %s5775_s0 = scalar_lea.vmem %s5705_s9, %s5279_s4  ;;  %s5777_s4 = sld [smem:[#allocation27_spill]] (!%p4128_p6) }
 0x6af   : > { %1803 = vrot.lane.b32.xlu1 %v5406_v0, %s5008_s26  ;;  %1805 = vrot.lane.b32.xlu0 %v5429_v11, %s5008_s26 }
 0x6b3   : > { %4690 = vrot.lane.b32.xlu1 %v5397_v58, %s5007_s27  ;;  %1712 = vrot.lane.b32.xlu0 %v5399_v59, %s5008_s26 }
 0x6b7   : > { %1714 = vrot.lane.b32.xlu1 %v5425_v10, %s5008_s26 }
 0x71d   : > { %v1522_v40 = vpop.xlane.xlu1 %1521 }
 0x71e   : > { %v1519_v41 = vpop.xlane.xlu0 %1518 }
 0x71f   : > { %4760 = vrcp.f32 %v1519_v41 }
 0x720   : > { %4762 = vrcp.f32 %v1522_v40 }
 0x722   : > { %v1525_v42 = vpop.xlane.xlu0 %1524 }
 0x723   : > { %4764 = vrcp.f32 %v1525_v42  ;;  %v1528_v43 = vpop.xlane.xlu1 %1527 }
 0x724   : > { %4766 = vrcp.f32 %v1528_v43 }
 0x726   : > { %v4676_v44 = vpop.permute.xlu0 %4675 }
 0x727   : > { %v4678_v45 = vunpack.i.h.bf16 %v4676_v44  ;;  %v4677_v46 = vunpack.i.l.bf16 %v4676_v44  ;;  %v4681_v47 = vpop.permute.xlu1 %4680 }
 0x728   : > { %v4683_v48 = vunpack.i.h.bf16 %v4681_v47  ;;  %v4682_v49 = vunpack.i.l.bf16 %v4681_v47 }
 0x729   : > { %v4761_v50 = vpop.eup %4760  ;;  %v4465_v51 = vpack.c.bf16 %v4678_v45, %v4677_v46 }
 0x72a   : > { %v4763_v52 = vpop.eup %4762  ;;  %v1806_v53 = vpop.permute.xlu0 %1805  ;;  %v1533_v54 = vmul.f32 %v4761_v50, %v4755_v33  ;;  %v4469_v55 = vpack.c.bf16 %v4683_v48, %v4682_v49 }
 0x72b   : > { %v4686_v56 = vpop.permute.xlu1 %4685  ;;  %4466 = vmatprep.subr.bf16.mxu1 %v4465_v51  ;;  %v1534_v62 = vmul.f32 %v4763_v52, %v4753_v32 }
 0x72c   : > { %v4688_v57 = vunpack.i.h.bf16 %v4686_v56  ;;  %v4687_v60 = vunpack.i.l.bf16 %v4686_v56  ;;  %4468 = vmatpush3.bf16.msra.mxu1 %v4465_v51  ;;  %4283 = vmatprep.mubr.msk.f32.mxu1 %vm1492_vm4, %v1533_v54 }
 0x72d   : > { %v4765_v61 = vpop.eup %4764  ;;  %4470 = vmatprep.subr.bf16.mxu1 %v4469_v55 }
 0x72e   : > { %v4767_v1 = vpop.eup %4766  ;;  %v1713_v2 = vpop.permute.xlu0 %1712  ;;  %v1535_v3 = vmul.f32 %v4765_v61, %v4757_v36  ;;  %v4479_v5 = vpack.c.bf16 %v4688_v57, %v4687_v60 }
 0x72f   : > { %v1804_v6 = vpop.permute.xlu1 %1803  ;;  %4284 = vmatmul.mubr.msk.f32.vlgmr.msra.gmra.mrb[6].mxu1 %vm1492_vm4, %v1534_v62  ;;  %4297 = vmatprep.mubr.msk.f32.mxu0 %vm1315_vm2, %v1713_v2  ;;  %v1536_v7 = vmul.f32 %v4767_v1, %v4759_v37 }
 0x730   : > { %4472 = vmatpush3.bf16.msra.mxu1 %v4469_v55  ;;  %4290 = vmatprep.mubr.msk.f32.mxu1 %vm1492_vm4, %v1535_v3 }
 0x731   : > { %4481 = vmatprep.subr.msk.bf16.mxu1 %vm5413_vm3, %v4479_v5 }
 0x733   : > { %v4691_v8 = vpop.permute.xlu1 %4690  ;;  %4291 = vmatmul.mubr.msk.f32.vlgmr.msra.gmra.mrb[8].mxu1 %vm1492_vm4, %v1536_v7 }
 0x734   : > { %v4693_v9 = vunpack.i.h.bf16 %v4691_v8  ;;  %v4692_v12 = vunpack.i.l.bf16 %v4691_v8  ;;  %4304 = vmatprep.mubr.msk.f32.mxu1 %vm1315_vm2, %v1804_v6 }
 0x736   : > { %v4473_v13 = vpack.c.bf16 %v4693_v9, %v4692_v12 }
 0x737   : > { %v1715_v14 = vpop.permute.xlu1 %1714 }
 0x738   : > { %4475 = vmatprep.subr.msk.bf16.mxu0 %vm5413_vm3, %v4473_v13 }
 0x739   : > { %4478 = vmatpush3.bf16.xpose.msk.msra.mxu0 %vm5413_vm3, %v4473_v13  ;;  %4484 = vmatpush3.bf16.xpose.msk.msra.mxu1 %vm5413_vm3, %v4479_v5 }
 0x740   : > { %4298 = vmatmul.mubr.msk.f32.vlgmr.msra.gmra.mrb[2].mxu0 %vm1315_vm2, %v1715_v14  ;;  %4305 = vmatmul.mubr.msk.f32.vlgmr.msra.gmra.mrb[10].mxu1 %vm1315_vm2, %v1806_v53 }
 0x802   : > { %v5465_v15 = vpop.f32.mrb[6].mxu1 }
 0x803   : > { %v5467_v16 = vpop.f32.mrb[7].mxu1 }
 0x806   : > { %v5469_v17 = vpop.f32.mrb[8].mxu1 }
 0x807   : > { %v5471_v18 = vpop.f32.mrb[9].mxu1 }
 0x813   : > { %v5473_v19 = vpop.f32.mrb[2].mxu0  ;;  %v4306_v20 = vpop.f32.mrb[10].mxu1 }
 0x814   : > { %v1794_v21 = vpop.f32.mrb[3].mxu0  ;;  %v1885_v22 = vpop.f32.mrb[11].mxu1  ;;  %v1903_v23 = vsel %vm1492_vm4, %v4306_v20, -inf  ;;  %v1897_v47 = vsel %vm1492_vm4, %v5473_v19, -inf }
 0x815   : > { %1904 = vmax.xlane.f32.xlu1 %v1903_v23  ;;  %v1900_v24 = vsel %vm1492_vm4, %v1885_v22, -inf  ;;  %v1894_v25 = vsel %vm1492_vm4, %v1794_v21, -inf }
 0x816   : > { %1901 = vmax.xlane.f32.xlu0 %v1900_v24 }
 0x826   : > { %4700 = vrot.lane.b32.xlu1 %v5397_v58, %s5009_s2 }
 0x82a   : > { %4705 = vrot.lane.b32.xlu1 %v5404_v63, %s5009_s2 }
 0x82e   : > { %2308 = vrot.lane.b32.xlu1 %v5399_v59, %s5010_s1 }
 0x832   : > { %2399 = vrot.lane.b32.xlu1 %v5406_v0, %s5010_s1 }
 0x856   : > { %1895 = vmax.xlane.f32.xlu1 %v1894_v25 }
 0x867   : > { %4710 = vrot.lane.b32.xlu1 %v5397_v58, %s5011_s20 }
 0x8a2   : > { %v1905_v26 = vpop.xlane.xlu1 %1904 }
 0x8a3   : > { %v1909_v27 = vsub.f32 %v4306_v20, %v1905_v26  ;;  %v1902_v28 = vpop.xlane.xlu0 %1901 }
 0x8a4   : > { %v1908_v29 = vsub.f32 %v1885_v22, %v1902_v28 }
 0x8a5   : > { %v1916_v30 = vmul.f32 1.442695, %v1909_v27 }
 0x8a6   : > { %v1914_v31 = vmul.f32 1.442695, %v1908_v29  ;;  %v4701_v36 = vpop.permute.xlu1 %4700 }
 0x8a7   : > { %4768 = vpow2.f32 %v1916_v30  ;;  %v4703_v53 = vunpack.i.h.bf16 %v4701_v36  ;;  %v4702_v54 = vunpack.i.l.bf16 %v4701_v36  ;;  %v4072_v36 = vld [vmem:[%s5294_s19 + $0x8] sm:$0xff] }
 0x8a8   : > { %4770 = vpow2.f32 %v1914_v31 }
 0x8a9   : > { %v4493_v60 = vpack.c.bf16 %v4703_v53, %v4702_v54 }
 0x8aa   : > { %v4706_v37 = vpop.permute.xlu1 %4705 }
 0x8ab   : > { %v4708_v3 = vunpack.i.h.bf16 %v4706_v37  ;;  %v4707_v5 = vunpack.i.l.bf16 %v4706_v37  ;;  %v1711_v37 = vld [vmem:[%s5294_s19] sm:$0xff] }
 0x8ad   : > { %v4499_v6 = vpack.c.bf16 %v4708_v3, %v4707_v5 }
 0x8ae   : > { %v2309_v38 = vpop.permute.xlu1 %2308 }
 0x8b1   : > { %v4769_v32 = vpop.eup %4768 }
 0x8b2   : > { %v1927_v33 = vsel %vm1492_vm4, %v4769_v32, 0.0  ;;  %v4771_v34 = vpop.eup %4770  ;;  %v2400_v39 = vpop.permute.xlu1 %2399 }
 0x8b3   : > { %1928 = vadd.xlane.f32.xlu0 %v1927_v33  ;;  %v1924_v35 = vsel %vm1492_vm4, %v4771_v34, 0.0 }
 0x8b7   : > { %1925 = vadd.xlane.f32.xlu0 %v1924_v35 }
 0x8cd   : > { %4695 = vrot.lane.b32.xlu0 %v5404_v63, %s5011_s20 }
 0x8d1   : > { %2310 = vrot.lane.b32.xlu0 %v5425_v10, %s5010_s1 }
 0x8d5   : > { %2401 = vrot.lane.b32.xlu0 %v5429_v11, %s5010_s1 }
 0x8e3   : > { %v1896_v40 = vpop.xlane.xlu1 %1895 }
 0x8e4   : > { %v1906_v41 = vsub.f32 %v1794_v21, %v1896_v40 }
 0x8e6   : > { %v1910_v42 = vmul.f32 1.442695, %v1906_v41 }
 0x8e7   : > { %v4711_v43 = vpop.permute.xlu1 %4710 }
 0x8e8   : > { %v4713_v44 = vunpack.i.h.bf16 %v4711_v43  ;;  %v4712_v45 = vunpack.i.l.bf16 %v4711_v43  ;;  %4772 = vpow2.f32 %v1910_v42 }
 0x8ea   : > { %v4485_v46 = vpack.c.bf16 %v4713_v44, %v4712_v45 }
 0x8ec   : > { %4486 = vmatprep.subr.bf16.mxu0 %v4485_v46 }
 0x8ed   : > { %4488 = vmatpush3.bf16.msra.mxu0 %v4485_v46 }
 0x8ee   : > { %4321 = vmatprep.subr.mxu0 %v4072_v36 }
 0x8f2   : > { %v4773_v48 = vpop.eup %4772 }
 0x8f3   : > { %v1918_v49 = vsel %vm1492_vm4, %v4773_v48, 0.0 }
 0x8f4   : > { %1898 = vmax.xlane.f32.xlu0 %v1897_v47 }
 0x8f8   : > { %1919 = vadd.xlane.f32.xlu0 %v1918_v49 }
 0x940   : > { %v1929_v50 = vpop.xlane.xlu0 %1928 }
 0x941   : > { %4774 = vrcp.f32 %v1929_v50 }
 0x944   : > { %v1926_v51 = vpop.xlane.xlu0 %1925 }
 0x945   : > { %4776 = vrcp.f32 %v1926_v51 }
 0x948   : > { %v4696_v52 = vpop.permute.xlu0 %4695 }
 0x949   : > { %v4698_v55 = vunpack.i.h.bf16 %v4696_v52  ;;  %v4697_v56 = vunpack.i.l.bf16 %v4696_v52 }
 0x94b   : > { %v4489_v57 = vpack.c.bf16 %v4698_v55, %v4697_v56  ;;  %v4775_v61 = vpop.eup %4774 }
 0x94c   : > { %v1937_v2 = vmul.f32 %v4775_v61, %v4769_v32  ;;  %v2311_v7 = vpop.permute.xlu0 %2310 }
 0x94d   : > { %4490 = vmatprep.subr.bf16.mxu1 %v4489_v57 }
 0x94e   : > { %4492 = vmatpush3.bf16.msra.mxu1 %v4489_v57 }
 0x94f   : > { %v4777_v62 = vpop.eup %4776  ;;  %4495 = vmatprep.subr.msk.bf16.mxu1 %vm5413_vm3, %v4493_v60 }
 0x950   : > { %v1936_v1 = vmul.f32 %v4777_v62, %v4771_v34  ;;  %v2402_v8 = vpop.permute.xlu0 %2401 }
 0x952   : > { %4318 = vmatprep.mubr.msk.f32.mxu1 %vm1492_vm4, %v1936_v1 }
 0x953   : > { %4319 = vmatmul.mubr.msk.f32.vlgmr.msra.gmra.mrb[12].mxu1 %vm1492_vm4, %v1937_v2 }
 0x954   : > { %4341 = vmatprep.mubr.msk.f32.mxu1 %vm1315_vm2, %v2309_v38 }
 0x957   : > { %4498 = vmatpush3.bf16.xpose.msk.msra.mxu1 %vm5413_vm3, %v4493_v60 }
 0x958   : > { %4501 = vmatprep.subr.msk.bf16.mxu1 %vm5413_vm3, %v4499_v6 }
 0x95e   : > { %4342 = vmatmul.mubr.msk.f32.vlgmr.msra.gmra.mrb[14].mxu1 %vm1315_vm2, %v2311_v7 }
 0x95f   : > { %4504 = vmatpush3.bf16.xpose.msk.msra.mxu1 %vm5413_vm3, %v4499_v6  ;;  %4348 = vmatprep.mubr.msk.f32.mxu1 %vm1315_vm2, %v2400_v39 }
 0x966   : > { %4349 = vmatmul.mubr.msk.f32.vlgmr.msra.gmra.mrb[16].mxu1 %vm1315_vm2, %v2402_v8 }
 0x981   : > { %v1899_v9 = vpop.xlane.xlu0 %1898 }
 0x982   : > { %v1907_v12 = vsub.f32 %v5473_v19, %v1899_v9  ;;  %v4093_v9 = vld [vmem:[%s5294_s19 + $0x10] sm:$0xff] }
 0x984   : > { %v1912_v13 = vmul.f32 1.442695, %v1907_v12 }
 0x985   : > { %v1920_v14 = vpop.xlane.xlu0 %1919 }
 0x986   : > { %4778 = vpow2.f32 %v1912_v13 }
 0x987   : > { %4780 = vrcp.f32 %v1920_v14 }
 0x990   : > { %v4779_v20 = vpop.eup %4778 }
 0x991   : > { %v4781_v21 = vpop.eup %4780  ;;  %v1921_v22 = vsel %vm1492_vm4, %v4779_v20, 0.0 }
 0x992   : > { %1922 = vadd.xlane.f32.xlu0 %v1921_v22  ;;  %v1934_v23 = vmul.f32 %v4781_v21, %v4773_v48 }
 0x994   : > { %4311 = vmatprep.mubr.msk.f32.mxu0 %vm1492_vm4, %v1934_v23 }
 0xa1f   : > { %v1923_v24 = vpop.xlane.xlu0 %1922 }
 0xa20   : > { %4782 = vrcp.f32 %v1923_v24 }
 0xa26   : > { %v5508_v25 = vpop.f32.mrb[12].mxu1 }
 0xa27   : > { %v2103_v26 = vpop.f32.mrb[13].mxu1 }
 0xa2a   : > { %v4783_v27 = vpop.eup %4782 }
 0xa2b   : > { %v1935_v19 = vmul.f32 %v4783_v27, %v4779_v20 }
 0xa2d   : > { %4312 = vmatmul.mubr.msk.f32.vlgmr.msra.gmra.mrb[4].mxu0 %vm1492_vm4, %v1935_v19 }
 0xa2e   : > { %4322 = vmatpush3.msra.mxu0 %v4072_v36 }
 0xa2f   : > { %4329 = vmatprep.subr.mxu0 %v1711_v37 }
 0xa31   : > { %v4343_v28 = vpop.f32.mrb[14].mxu1 }
 0xa32   : > { %v2390_v29 = vpop.f32.mrb[15].mxu1  ;;  %v2493_v30 = vsel %vm1492_vm4, %v4343_v28, -inf }
 0xa33   : > { %2494 = vmax.xlane.f32.xlu0 %v2493_v30  ;;  %v2490_v31 = vsel %vm1492_vm4, %v2390_v29, -inf }
 0xa37   : > { %2491 = vmax.xlane.f32.xlu0 %v2490_v31 }
 0xa39   : > { %v4350_v32 = vpop.f32.mrb[16].mxu1 }
 0xa3a   : > { %v2481_v33 = vpop.f32.mrb[17].mxu1  ;;  %v2499_v35 = vsel %vm1492_vm4, %v4350_v32, -inf }
 0xa3b   : > { %v2496_v34 = vsel %vm1492_vm4, %v2481_v33, -inf }
 0xa3c   : > { %2497 = vmax.xlane.f32.xlu0 %v2496_v34 }
 0xa40   : > { %2500 = vmax.xlane.f32.xlu0 %v2499_v35 }
 0xac0   : > { %v2495_v38 = vpop.xlane.xlu0 %2494 }
 0xac1   : > { %v2503_v39 = vsub.f32 %v4343_v28, %v2495_v38 }
 0xac3   : > { %v2508_v40 = vmul.f32 1.442695, %v2503_v39 }
 0xac4   : > { %v2492_v41 = vpop.xlane.xlu0 %2491 }
 0xac5   : > { %4784 = vpow2.f32 %v2508_v40  ;;  %v2502_v42 = vsub.f32 %v2390_v29, %v2492_v41 }
 0xac7   : > { %v2506_v43 = vmul.f32 1.442695, %v2502_v42 }
 0xac9   : > { %4786 = vpow2.f32 %v2506_v43  ;;  %v2498_v44 = vpop.xlane.xlu0 %2497 }
 0xaca   : > { %v2504_v45 = vsub.f32 %v2481_v33, %v2498_v44 }
 0xacc   : > { %v2510_v49 = vmul.f32 1.442695, %v2504_v45 }
 0xacd   : > { %v2501_v46 = vpop.xlane.xlu0 %2500 }
 0xace   : > { %v2505_v47 = vsub.f32 %v4350_v32, %v2501_v46 }
 0xacf   : > { %v5517_v48 = vpop.eup %4784 }
 0xad0   : > { %v2512_v50 = vmul.f32 1.442695, %v2505_v47  ;;  %v2517_v51 = vsel %vm1492_vm4, %v5517_v48, 0.0 }
 0xad1   : > { %2518 = vadd.xlane.f32.xlu0 %v2517_v51 }
 0xad2   : > { %4788 = vpow2.f32 %v2512_v50 }
 0xad3   : > { %v4787_v52 = vpop.eup %4786  ;;  %4790 = vpow2.f32 %v2510_v49 }
 0xad4   : > { %v2514_v53 = vsel %vm1492_vm4, %v4787_v52, 0.0 }
 0xad5   : > { %2515 = vadd.xlane.f32.xlu1 %v2514_v53 }
 0xadc   : > { %v5522_v54 = vpop.eup %4788 }
 0xadd   : > { %v2523_v55 = vsel %vm1492_vm4, %v5522_v54, 0.0  ;;  %v4791_v56 = vpop.eup %4790 }
 0xade   : > { %2524 = vadd.xlane.f32.xlu0 %v2523_v55  ;;  %v2520_v57 = vsel %vm1492_vm4, %v4791_v56, 0.0 }
 0xae2   : > { %2521 = vadd.xlane.f32.xlu0 %v2520_v57 }
 0xae6   : > { %4720 = vrot.lane.b32.xlu1 %v5404_v63, %s5012_s21 }
 0xaea   : > { %2904 = vrot.lane.b32.xlu1 %v5429_v11, %s5013_s24 }
 0xaf8   : > { %4715 = vrot.lane.b32.xlu0 %v5397_v58, %s5012_s21 }
 0xafc   : > { %4725 = vrot.lane.b32.xlu0 %v5397_v58, %s5014_s22 }
 0xb00   : > { %v4313_v60 = vpop.f32.mrb[4].mxu0  ;;  %4730 = vrot.lane.b32.xlu0 %v5404_v63, %s5014_s22 }
 0xb01   : > { %v2016_v61 = vpop.f32.mrb[5].mxu0 }
 0xb02   : > { %4323 = vmatprep.mubr.msk.f32.mxu0 %vm1315_vm2, %v2016_v61 }
 0xb03   : > { %4324 = vmatmul.mubr.msk.f32.vlgmr.msra.gmra.mrb[6].mxu0 %vm1315_vm2, %v4313_v60 }
 0xb04   : > { %2811 = vrot.lane.b32.xlu0 %v5399_v59, %s5013_s24  ;;  %4326 = vmatprep.mubr.msk.f32.mxu0 %vm1315_vm2, %v2103_v26 }
 0xb05   : > { %4330 = vmatpush3.msra.mxu0 %v1711_v37 }
 0xb07   : > { %4327 = vmatmul.mubr.msk.f32.gmra.mrb[8].mxu0 %vm1315_vm2, %v5508_v25 }
 0xb08   : > { %2813 = vrot.lane.b32.xlu0 %v5425_v10, %s5013_s24  ;;  %4331 = vmatprep.mubr.msk.f32.mxu0 %vm1315_vm2, %v5467_v16 }
 0xb0b   : > { %4332 = vmatmul.mubr.msk.f32.vlgmr.msra.gmra.mrb[6].mxu0 %vm1315_vm2, %v5465_v15 }
 0xb0c   : > { %2902 = vrot.lane.b32.xlu0 %v5406_v0, %s5013_s24  ;;  %4334 = vmatprep.mubr.msk.f32.mxu0 %vm1315_vm2, %v5471_v18  ;;  %s5778_s24 = sld [smem:[#allocation28_spill]] (!%p4128_p6) }
 0xb0f   : > { %4335 = vmatmul.mubr.msk.f32.gmra.mrb[8].mxu0 %vm1315_vm2, %v5469_v17 }
 0xb5e   : > { %v2519_v62 = vpop.xlane.xlu0 %2518 }
 0xb62   : > { %v2516_v59 = vpop.xlane.xlu1 %2515 }
 0xb63   : > { %4792 = vrcp.f32 %v2516_v59 }
 0xb64   : > { %4794 = vrcp.f32 %v2519_v62 }
 0xb66   : > { %v4721_v11 = vpop.permute.xlu1 %4720 }
 0xb67   : > { %v4723_v1 = vunpack.i.h.bf16 %v4721_v11  ;;  %v4722_v10 = vunpack.i.l.bf16 %v4721_v11 }
 0xb69   : > { %v4509_v2 = vpack.c.bf16 %v4723_v1, %v4722_v10 }
 0xb6a   : > { %v2905_v35 = vpop.permute.xlu1 %2904 }
 0xb6b   : > { %4510 = vmatprep.subr.bf16.mxu1 %v4509_v2  ;;  %v2525_v16 = vpop.xlane.xlu0 %2524 }
 0xb6c   : > { %4512 = vmatpush3.bf16.msra.mxu1 %v4509_v2  ;;  %4796 = vrcp.f32 %v2525_v16 }
 0xb6d   : > { %v4793_v15 = vpop.eup %4792 }
 0xb6e   : > { %v2530_v0 = vmul.f32 %v4793_v15, %v4787_v52  ;;  %v4795_v7 = vpop.eup %4794 }
 0xb6f   : > { %v2522_v3 = vpop.xlane.xlu0 %2521  ;;  %v2531_v21 = vmul.f32 %v4795_v7, %v5517_v48 }
 0xb70   : > { %4798 = vrcp.f32 %v2522_v3  ;;  %4355 = vmatprep.mubr.msk.f32.mxu0 %vm1492_vm4, %v2530_v0 }
 0xb73   : > { %v4716_v17 = vpop.permute.xlu0 %4715 }
 0xb74   : > { %v4718_v18 = vunpack.i.h.bf16 %v4716_v17  ;;  %v4717_v5 = vunpack.i.l.bf16 %v4716_v17 }
 0xb76   : > { %v4505_v6 = vpack.c.bf16 %v4718_v18, %v4717_v5  ;;  %v4797_v14 = vpop.eup %4796 }
 0xb77   : > { %v4726_v8 = vpop.permute.xlu0 %4725  ;;  %v2533_v25 = vmul.f32 %v4797_v14, %v5522_v54 }
 0xb78   : > { %v4728_v12 = vunpack.i.h.bf16 %v4726_v8  ;;  %v4727_v13 = vunpack.i.l.bf16 %v4726_v8  ;;  %4506 = vmatprep.subr.bf16.mxu0 %v4505_v6 }
 0xb79   : > { %4508 = vmatpush3.bf16.msra.mxu0 %v4505_v6 }
 0xb7a   : > { %v4799_v20 = vpop.eup %4798  ;;  %v4513_v22 = vpack.c.bf16 %v4728_v12, %v4727_v13  ;;  %4365 = vmatprep.subr.mxu0 %v4093_v9 }
 0xb7b   : > { %v4731_v23 = vpop.permute.xlu0 %4730  ;;  %v2532_v24 = vmul.f32 %v4799_v20, %v4791_v56 }
 0xb7c   : > { %v4733_v26 = vunpack.i.h.bf16 %v4731_v23  ;;  %v4732_v27 = vunpack.i.l.bf16 %v4731_v23  ;;  %4356 = vmatmul.mubr.msk.f32.vlgmr.msra.gmra.mrb[10].mxu0 %vm1492_vm4, %v2531_v21  ;;  %4515 = vmatprep.subr.msk.bf16.mxu1 %vm5413_vm3, %v4513_v22  ;;  %v4110_v21 = vld [vmem:[%s5294_s19 + $0x18] sm:$0xff]  ;;  %v3330_v23 = vld [vmem:[%s5311_s23 + $0x8] sm:$0xff]  ;;  %s5779_s19 = sld [smem:[#allocation29_spill]] (!%p4128_p6) }
 0xb7d   : > { %4362 = vmatprep.mubr.msk.f32.mxu1 %vm1492_vm4, %v2532_v24  ;;  %4366 = vmatpush3.msra.mxu0 %v4093_v9 }
 0xb7e   : > { %v4519_v19 = vpack.c.bf16 %v4733_v26, %v4732_v27  ;;  %4363 = vmatmul.mubr.msk.f32.vlgmr.msra.gmra.mrb[18].mxu1 %vm1492_vm4, %v2533_v25 }
 0xb7f   : > { %4518 = vmatpush3.bf16.xpose.msk.msra.mxu1 %vm5413_vm3, %v4513_v22  ;;  %v2812_v28 = vpop.permute.xlu0 %2811  ;;  %v3329_v22 = vld [vmem:[%s5311_s23] sm:$0xff] }
 0xb80   : > { %4377 = vmatprep.mubr.msk.f32.mxu1 %vm1315_vm2, %v2812_v28  ;;  %4521 = vmatprep.subr.msk.bf16.mxu0 %vm5413_vm3, %v4519_v19  ;;  %v4533_v24 = vpack.c.bf16 %v3330_v23, %v3329_v22  ;;  %v3331_v28 = vld [vmem:[%s5311_s23 + $0x10] sm:$0xff] }
 0xb83   : > { %v2814_v29 = vpop.permute.xlu0 %2813 }
 0xb86   : > { %4378 = vmatmul.mubr.msk.f32.vlgmr.msra.gmra.mrb[20].mxu1 %vm1315_vm2, %v2814_v29  ;;  %v3332_v29 = vld [vmem:[%s5311_s23 + $0x18] sm:$0xff]  ;;  %s5780_s23 = sld [smem:[#allocation30_spill]] (!%p4128_p6) }
 0xb87   : > { %v2903_v34 = vpop.permute.xlu0 %2902 }
 0xc4f   : > { %v4357_v30 = vpop.f32.mrb[10].mxu0 }
 0xc50   : > { %v2612_v31 = vpop.f32.mrb[11].mxu0 }
 0xc51   : > { %v4364_v32 = vpop.f32.mrb[18].mxu1  ;;  %4367 = vmatprep.mubr.msk.f32.mxu0 %vm1315_vm2, %v2612_v31  ;;  %v4115_v31 = vld [vmem:[%s5775_s0] ss:$0 sm:$0xff] }
 0xc52   : > { %v2699_v33 = vpop.f32.mrb[19].mxu1  ;;  %4368 = vmatmul.mubr.msk.f32.vlgmr.msra.gmra.mrb[6].mxu0 %vm1315_vm2, %v4357_v30  ;;  %v4537_v30 = vpack.c.bf16 %v3332_v29, %v3331_v28 }
 0xc53   : > { %4524 = vmatpush3.bf16.xpose.msk.msra.mxu0 %vm5413_vm3, %v4519_v19  ;;  %4370 = vmatprep.mubr.msk.f32.mxu0 %vm1315_vm2, %v2699_v33 }
 0xc56   : > { %4371 = vmatmul.mubr.msk.f32.gmra.mrb[8].mxu0 %vm1315_vm2, %v4364_v32 }
 0xc57   : > { %4384 = vmatprep.mubr.msk.f32.mxu0 %vm1315_vm2, %v2903_v34 }
 0xc59   : > { %v4379_v36 = vpop.f32.mrb[20].mxu1 }
 0xc5a   : > { %v2893_v37 = vpop.f32.mrb[21].mxu1  ;;  %v2996_v38 = vsel %vm1492_vm4, %v4379_v36, -inf  ;;  %4385 = vmatmul.mubr.msk.f32.vlgmr.msra.gmra.mrb[12].mxu0 %vm1315_vm2, %v2905_v35 }
 0xc5b   : > { %2997 = vmax.xlane.f32.xlu1 %v2996_v38  ;;  %v2993_v39 = vsel %vm1492_vm4, %v2893_v37, -inf  ;;  %v4833_v38 = vld [vmem:[#allocation2 + $0x8] sm:$0xff] }
 0xc5c   : > { %2994 = vmax.xlane.f32.xlu0 %v2993_v39 }
 0xce8   : > { %v2998_v44 = vpop.xlane.xlu1 %2997 }
 0xce9   : > { %v2995_v4 = vpop.xlane.xlu0 %2994  ;;  %v3006_v45 = vsub.f32 %v4379_v36, %v2998_v44  ;;  %v4832_v36 = vld [vmem:[#allocation2] sm:$0xff] }
 0xcea   : > { %v3005_v40 = vsub.f32 %v2893_v37, %v2995_v4 }
 0xceb   : > { %v3011_v46 = vmul.f32 1.442695, %v3006_v45  ;;  %v4835_v45 = vld [vmem:[#allocation2 + $0x18] sm:$0xff] }
 0xcec   : > { %v3009_v41 = vmul.f32 1.442695, %v3005_v40 }
 0xcee   : > { %4800 = vpow2.f32 %v3009_v41 }
 0xcef   : > { %4802 = vpow2.f32 %v3011_v46 }
 0xcf8   : > { %v4801_v42 = vpop.eup %4800 }
 0xcf9   : > { %v3017_v43 = vsel %vm1492_vm4, %v4801_v42, 0.0  ;;  %v4803_v51 = vpop.eup %4802 }
 0xcfa   : > { %3018 = vadd.xlane.f32.xlu1 %v3017_v43  ;;  %v3020_v52 = vsel %vm1492_vm4, %v4803_v51, 0.0  ;;  %v4834_v43 = vld [vmem:[#allocation2 + $0x10] sm:$0xff] }
 0xd2d   : > { %v4386_v47 = vpop.f32.mrb[12].mxu0 }
 0xd2e   : > { %v2984_v48 = vpop.f32.mrb[13].mxu0  ;;  %v3002_v50 = vsel %vm1492_vm4, %v4386_v47, -inf }
 0xd2f   : > { %v2999_v49 = vsel %vm1492_vm4, %v2984_v48, -inf }
 0xd30   : > { %3000 = vmax.xlane.f32.xlu0 %v2999_v49 }
 0xd34   : > { %3003 = vmax.xlane.f32.xlu0 %v3002_v50  ;;  %v3475_v50 = vld [vmem:[%s5321_s3 + $0x10] sm:$0xff] }
 0xd38   : > { %3021 = vadd.xlane.f32.xlu0 %v3020_v52 }
 0xd87   : > { %v3019_v53 = vpop.xlane.xlu1 %3018 }
 0xd88   : > { %4804 = vrcp.f32 %v3019_v53  ;;  %v3477_v53 = vld [vmem:[%s5321_s3 + $0x20] sm:$0xff] }
 0xd92   : > { %v4805_v54 = vpop.eup %4804 }
 0xd93   : > { %v3033_v55 = vmul.f32 %v4805_v54, %v4801_v42  ;;  %v3478_v54 = vld [vmem:[%s5321_s3 + $0x28] sm:$0xff] }
 0xd95   : > { %4391 = vmatprep.mubr.msk.f32.mxu1 %vm1492_vm4, %v3033_v55  ;;  %v4549_v55 = vpack.c.bf16 %v3478_v54, %v3477_v53 }
 0xdbd   : > { %v3001_v56 = vpop.xlane.xlu0 %3000 }
 0xdbe   : > { %v3007_v57 = vsub.f32 %v2984_v48, %v3001_v56  ;;  %v3474_v48 = vld [vmem:[%s5321_s3 + $0x8] sm:$0xff]  ;;  %v3479_v56 = vld [vmem:[%s5321_s3 + $0x30] sm:$0xff] }
 0xdc0   : > { %v3013_v60 = vmul.f32 1.442695, %v3007_v57  ;;  %v3480_v57 = vld [vmem:[%s5321_s3 + $0x38] sm:$0xff] }
 0xdc1   : > { %v3004_v61 = vpop.xlane.xlu0 %3003 }
 0xdc2   : > { %4806 = vpow2.f32 %v3013_v60  ;;  %v3008_v59 = vsub.f32 %v4386_v47, %v3004_v61  ;;  %v3473_v47 = vld [vmem:[%s5321_s3] sm:$0xff]  ;;  %v4553_v60 = vpack.c.bf16 %v3480_v57, %v3479_v56 }
 0xdc3   : > { %v4541_v49 = vpack.c.bf16 %v3474_v48, %v3473_v47  ;;  %v4116_v61 = vld [vmem:[%s925_s8] ss:$0 sm:$0xff] }
 0xdc4   : > { %v3015_v11 = vmul.f32 1.442695, %v3008_v59 }
 0xdc5   : > { %v3022_v16 = vpop.xlane.xlu0 %3021 }
 0xdc6   : > { %4808 = vpow2.f32 %v3015_v11 }
 0xdc7   : > { %4810 = vrcp.f32 %v3022_v16 }
 0xdcc   : > { %v4807_v62 = vpop.eup %4806 }
 0xdcd   : > { %v3023_v1 = vsel %vm1492_vm4, %v4807_v62, 0.0 }
 0xdce   : > { %3024 = vadd.xlane.f32.xlu1 %v3023_v1 }
 0xdd0   : > { %v4809_v10 = vpop.eup %4808 }
 0xdd1   : > { %v3026_v2 = vsel %vm1492_vm4, %v4809_v10, 0.0  ;;  %v4811_v6 = vpop.eup %4810 }
 0xdd2   : > { %3027 = vadd.xlane.f32.xlu0 %v3026_v2 }
 0xddf   : > { %4735 = vrot.lane.b32.xlu1 %v5397_v58, %s5015_s5 }
 0xde8   : > { %4740 = vrot.lane.b32.xlu0 %v5404_v63, %s5015_s5  ;;  %v3034_v63 = vmul.f32 %v4811_v6, %v4803_v51  ;;  %v3476_v51 = vld [vmem:[%s5321_s3 + $0x18] sm:$0xff] }
 0xde9   : > { %v4545_v52 = vpack.c.bf16 %v3476_v51, %v3475_v50 }
 0xe5b   : > { %v3025_v15 = vpop.xlane.xlu1 %3024 }
 0xe5c   : > { %4812 = vrcp.f32 %v3025_v15 }
 0xe5f   : > { %v4736_v0 = vpop.permute.xlu1 %4735  ;;  %v3028_v3 = vpop.xlane.xlu0 %3027 }
 0xe60   : > { %v4738_v17 = vunpack.i.h.bf16 %v4736_v0  ;;  %v4737_v18 = vunpack.i.l.bf16 %v4736_v0  ;;  %4814 = vrcp.f32 %v3028_v3 }
 0xe62   : > { %v4525_v5 = vpack.c.bf16 %v4738_v17, %v4737_v18 }
 0xe63   : > { %v4741_v7 = vpop.permute.xlu0 %4740 }
 0xe64   : > { %v4743_v8 = vunpack.i.h.bf16 %v4741_v7  ;;  %v4742_v9 = vunpack.i.l.bf16 %v4741_v7  ;;  %4526 = vmatprep.subr.bf16.mxu1 %v4525_v5 }
 0xe65   : > { %4528 = vmatpush3.bf16.msra.mxu1 %v4525_v5 }
 0xe66   : > { %v4813_v58 = vpop.eup %4812  ;;  %v4529_v12 = vpack.c.bf16 %v4743_v8, %v4742_v9  ;;  %4534 = vmatprep.subr.bf16.mxu1 %v4533_v24 }
 0xe67   : > { %v3035_v13 = vmul.f32 %v4813_v58, %v4807_v62 }
 0xe68   : > { %4392 = vmatmul.mubr.msk.f32.vlgmr.msra.gmra.mrb[22].mxu1 %vm1492_vm4, %v3034_v63  ;;  %4530 = vmatprep.subr.bf16.mxu0 %v4529_v12 }
 0xe69   : > { %4532 = vmatpush3.bf16.msra.mxu0 %v4529_v12  ;;  %4398 = vmatprep.mubr.msk.f32.mxu0 %vm1492_vm4, %v3035_v13 }
 0xe6a   : > { %v4815_v14 = vpop.eup %4814  ;;  %4401 = vmatprep.subr.mxu0 %v4110_v21  ;;  %4536 = vmatpush3.bf16.msra.mxu1 %v4533_v24 }
 0xe6b   : > { %v3036_v20 = vmul.f32 %v4815_v14, %v4809_v10  ;;  %4538 = vmatprep.subr.bf16.mxu1 %v4537_v30 }
 0xe6d   : > { %4399 = vmatmul.mubr.msk.f32.vlgmr.msra.gmra.mrb[14].mxu0 %vm1492_vm4, %v3036_v20 }
 0xe6e   : > { %4402 = vmatpush3.msra.mxu0 %v4110_v21  ;;  %4540 = vmatpush3.bf16.msra.mxu1 %v4537_v30 }
 0xe6f   : > { %4542 = vmatprep.subr.bf16.mxu0 %v4541_v49 }
 0xf3b   : > { %v4393_v25 = vpop.f32.mrb[22].mxu1 }
 0xf3c   : > { %v3115_v26 = vpop.f32.mrb[23].mxu1 }
 0xf3d   : > { %4403 = vmatprep.mubr.msk.f32.mxu0 %vm1315_vm2, %v3115_v26 }
 0xf3e   : > { %4404 = vmatmul.mubr.msk.f32.vlgmr.msra.gmra.mrb[6].mxu0 %vm1315_vm2, %v4393_v25 }
 0xf3f   : > { %4544 = vmatpush3.bf16.msra.mxu0 %v4541_v49 }
 0xf40   : > { %v4400_v27 = vpop.f32.mrb[14].mxu0  ;;  %4546 = vmatprep.subr.bf16.mxu0 %v4545_v52 }
 0xf41   : > { %v3202_v19 = vpop.f32.mrb[15].mxu0 }
 0xf42   : > { %4406 = vmatprep.mubr.msk.f32.mxu0 %vm1315_vm2, %v3202_v19 }
 0xf43   : > { %4407 = vmatmul.mubr.msk.f32.gmra.mrb[8].mxu0 %vm1315_vm2, %v4400_v27 }
 0xf44   : > { %4548 = vmatpush3.bf16.msra.mxu0 %v4545_v52 }
 0xf45   : > { %4550 = vmatprep.subr.bf16.mxu0 %v4549_v55 }
 0xf48   : > { %4552 = vmatpush3.bf16.msra.mxu0 %v4549_v55 }
 0xf49   : > { %4554 = vmatprep.subr.bf16.mxu0 %v4553_v60 }
 0xf4c   : > { %4556 = vmatpush3.bf16.msra.mxu0 %v4553_v60 }
0x1011   : > { %v4405_v32 = vpop.f32.mrb[6].mxu0 }
0x1012   : > { %v3322_v33 = vadd.f32 %v4405_v32, %v4115_v31  ;;  %v3291_v34 = vpop.f32.mrb[7].mxu0 }
0x1013   : > { %v3321_v35 = vadd.f32 %v4115_v31, %v3291_v34 }
0x1014   : > { %v5601_v39 = vadd.f32 %v4833_v38, %v3322_v33 }
0x1015   : > { %v5599_v37 = vadd.f32 %v4832_v36, %v3321_v35 }
0x1016   : > { %v4408_v4 = vpop.f32.mrb[8].mxu0 }
0x1017   : > { %v3324_v40 = vadd.f32 %v4408_v4, %v4115_v31  ;;  %v3301_v41 = vpop.f32.mrb[9].mxu0  ;;  %4417 = vmatprep.mubr.msk.f32.mxu1 %vm1123_vm1, %v5599_v37 }
0x1018   : > { %v3323_v42 = vadd.f32 %v4115_v31, %v3301_v41  ;;  %4418 = vmatmul.mubr.msk.f32.vlgmr.msra.gmra.mrb[24].mxu1 %vm1123_vm1, %v5601_v39 }
0x1019   : > { %v5609_v46 = vadd.f32 %v4835_v45, %v3324_v40 }
0x101a   : > { %v5607_v44 = vadd.f32 %v4834_v43, %v3323_v42  ;;  %v4121_v42 = vld [vmem:[%s933_s6] ss:$0 sm:$0xff] }
0x101c   : > { %4420 = vmatprep.mubr.msk.f32.mxu1 %vm1123_vm1, %v5607_v44 }
0x101d   : > { %4421 = vmatmul.mubr.msk.f32.gmra.mrb[26].mxu1 %vm1123_vm1, %v5609_v46 }
0x10eb   : > { %v4419_v59 = vpop.f32.mrb[24].mxu1 }
0x10ec   : > { %v3424_v11 = vadd.f32 %v4419_v59, %v4116_v61  ;;  %v3418_v62 = vpop.f32.mrb[25].mxu1 }
0x10ed   : > { %v3419_v1 = vadd.f32 %v4116_v61, %v3418_v62 }
0x10ee   : > { %v3442_v10 = vmul.f32 0.044715, %v3424_v11  ;;  %v3438_v30 = vmul.f32 0.5, %v3424_v11 }
0x10ef   : > { %v3441_v2 = vmul.f32 0.044715, %v3419_v1  ;;  %v3437_v28 = vmul.f32 0.5, %v3419_v1 }
0x10f0   : > { %v3446_v16 = vmul.f32 %v3442_v10, %v3424_v11  ;;  %v4422_v15 = vpop.f32.mrb[26].mxu1 }
0x10f1   : > { %v3445_v0 = vmul.f32 %v3441_v2, %v3419_v1  ;;  %v3434_v3 = vadd.f32 %v4422_v15, %v4116_v61  ;;  %v3428_v17 = vpop.f32.mrb[27].mxu1 }
0x10f2   : > { %v3450_v18 = vmul.f32 %v3446_v16, %v3424_v11  ;;  %v3429_v5 = vadd.f32 %v4116_v61, %v3428_v17 }
0x10f3   : > { %v3449_v6 = vmul.f32 %v3445_v0, %v3419_v1  ;;  %v3444_v7 = vmul.f32 0.044715, %v3434_v3  ;;  %v3440_v4 = vmul.f32 0.5, %v3434_v3 }
0x10f4   : > { %v3454_v8 = vadd.f32 %v3450_v18, %v3424_v11  ;;  %v3443_v9 = vmul.f32 0.044715, %v3429_v5  ;;  %v3439_v36 = vmul.f32 0.5, %v3429_v5 }
0x10f5   : > { %v3453_v58 = vadd.f32 %v3449_v6, %v3419_v1  ;;  %v3448_v63 = vmul.f32 %v3444_v7, %v3434_v3 }
0x10f6   : > { %v3458_v12 = vmul.f32 0.7978846, %v3454_v8  ;;  %v3447_v13 = vmul.f32 %v3443_v9, %v3429_v5 }
0x10f7   : > { %v3452_v14 = vmul.f32 %v3448_v63, %v3434_v3  ;;  %v3457_v20 = vmul.f32 0.7978846, %v3453_v58 }
0x10f8   : > { %4816 = vtanh.f32 %v3458_v12  ;;  %v3451_v21 = vmul.f32 %v3447_v13, %v3429_v5 }
0x10f9   : > { %v3456_v22 = vadd.f32 %v3452_v14, %v3434_v3  ;;  %4818 = vtanh.f32 %v3457_v20 }
0x10fa   : > { %v3455_v23 = vadd.f32 %v3451_v21, %v3429_v5 }
0x10fb   : > { %v3460_v24 = vmul.f32 0.7978846, %v3456_v22 }
0x10fc   : > { %v3459_v25 = vmul.f32 0.7978846, %v3455_v23 }
0x10fd   : > { %4820 = vtanh.f32 %v3460_v24 }
0x10fe   : > { %4822 = vtanh.f32 %v3459_v25 }
0x1102   : > { %v4817_v26 = vpop.eup %4816 }
0x1103   : > { %v4819_v27 = vpop.eup %4818  ;;  %v3466_v19 = vadd.f32 1.0, %v4817_v26 }
0x1104   : > { %v3465_v29 = vadd.f32 1.0, %v4819_v27 }
0x1105   : > { %v3470_v33 = vmul.f32 %v3466_v19, %v3438_v30  ;;  %v4126_v19 = vld [vmem:[%s936_s25] ss:$0 sm:$0xff] }
0x1106   : > { %v3469_v31 = vmul.f32 %v3465_v29, %v3437_v28  ;;  %v4127_v30 = vld [vmem:[%s939_s12] ss:$0 sm:$0xff] }
0x1107   : > { %v4821_v32 = vpop.eup %4820 }
0x1108   : > { %v4823_v34 = vpop.eup %4822  ;;  %4439 = vmatprep.mubr.msk.f32.mxu0 %vm3488_vm5, %v3469_v31  ;;  %v3468_v35 = vadd.f32 1.0, %v4821_v32 }
0x1109   : > { %4440 = vmatmul.mubr.msk.f32.vlgmr.msra.gmra.mrb[16].mxu0 %vm3488_vm5, %v3470_v33  ;;  %v3467_v38 = vadd.f32 1.0, %v4823_v34 }
0x110a   : > { %v3472_v41 = vmul.f32 %v3468_v35, %v3440_v4 }
0x110b   : > { %v3471_v40 = vmul.f32 %v3467_v38, %v3439_v36 }
0x110d   : > { %4442 = vmatprep.mubr.msk.f32.mxu0 %vm3488_vm5, %v3471_v40 }
0x110e   : > { %4443 = vmatmul.mubr.msk.f32.gmra.mrb[18].mxu0 %vm3488_vm5, %v3472_v41 }
0x11dc   : > { %v4441_v43 = vpop.f32.mrb[16].mxu0 }
0x11dd   : > { %v3573_v45 = vadd.f32 %v4441_v43, %v4121_v42  ;;  %v3567_v47 = vpop.f32.mrb[17].mxu0 }
0x11de   : > { %v3568_v48 = vadd.f32 %v4121_v42, %v3567_v47 }
0x11df   : > { %v3587_v49 = vadd.f32 %v3573_v45, %v5601_v39 }
0x11e0   : > { %v3586_v50 = vadd.f32 %v3568_v48, %v5599_v37 }
0x11e1   : > { %v4444_v51 = vpop.f32.mrb[18].mxu0  ;;  %v3595_v52 = vsel %vm1123_vm1, %v3587_v49, 0.0 }
0x11e2   : > { %v3583_v53 = vadd.f32 %v4444_v51, %v4121_v42  ;;  %3596 = vadd.xlane.f32.xlu0 %v3595_v52  ;;  %v3577_v54 = vpop.f32.mrb[19].mxu0  ;;  %v3592_v55 = vsel %vm1123_vm1, %v3586_v50, 0.0 }
0x11e3   : > { %v3578_v56 = vadd.f32 %v4121_v42, %v3577_v54  ;;  %3593 = vadd.xlane.f32.xlu1 %v3592_v55 }
0x11e4   : > { %v3589_v57 = vadd.f32 %v3583_v53, %v5609_v46 }
0x11e5   : > { %v3588_v60 = vadd.f32 %v3578_v56, %v5607_v44 }
0x11e6   : > { %v3601_v61 = vsel %vm1123_vm1, %v3589_v57, 0.0 }
0x11e7   : > { %3602 = vadd.xlane.f32.xlu0 %v3601_v61  ;;  %v3598_v39 = vsel %vm1123_vm1, %v3588_v60, 0.0 }
0x11e8   : > { %3599 = vadd.xlane.f32.xlu1 %v3598_v39 }
0x126f   : > { %v3597_v37 = vpop.xlane.xlu0 %3596 }
0x1270   : > { %v3605_v59 = vmul.f32 0.03125, %v3597_v37  ;;  %v3594_v11 = vpop.xlane.xlu1 %3593 }
0x1271   : > { %v3604_v62 = vmul.f32 0.03125, %v3594_v11 }
0x1272   : > { %v3609_v1 = vsub.f32 %v3587_v49, %v3605_v59 }
0x1273   : > { %v3608_v10 = vsub.f32 %v3586_v50, %v3604_v62 }
0x1274   : > { %v3603_v2 = vpop.xlane.xlu0 %3602  ;;  %v3613_v16 = vmul.f32 %v3609_v1, %v3609_v1 }
0x1275   : > { %v3607_v15 = vmul.f32 0.03125, %v3603_v2  ;;  %v3600_v0 = vpop.xlane.xlu1 %3599  ;;  %v3612_v3 = vmul.f32 %v3608_v10, %v3608_v10 }
0x1276   : > { %v3606_v46 = vmul.f32 0.03125, %v3600_v0  ;;  %v3619_v44 = vsel %vm1123_vm1, %v3613_v16, 0.0 }
0x1277   : > { %v3611_v17 = vsub.f32 %v3589_v57, %v3607_v15  ;;  %3620 = vadd.xlane.f32.xlu0 %v3619_v44  ;;  %v3616_v18 = vsel %vm1123_vm1, %v3612_v3, 0.0 }
0x1278   : > { %v3610_v5 = vsub.f32 %v3588_v60, %v3606_v46  ;;  %3617 = vadd.xlane.f32.xlu1 %v3616_v18 }
0x1279   : > { %v3615_v6 = vmul.f32 %v3611_v17, %v3611_v17 }
0x127a   : > { %v3614_v7 = vmul.f32 %v3610_v5, %v3610_v5 }
0x127b   : > { %v3625_v8 = vsel %vm1123_vm1, %v3615_v6, 0.0 }
0x127c   : > { %3626 = vadd.xlane.f32.xlu0 %v3625_v8  ;;  %v3622_v9 = vsel %vm1123_vm1, %v3614_v7, 0.0 }
0x127d   : > { %3623 = vadd.xlane.f32.xlu1 %v3622_v9 }
0x1304   : > { %v3621_v58 = vpop.xlane.xlu0 %3620 }
0x1305   : > { %v3629_v63 = vmul.f32 0.03125, %v3621_v58  ;;  %v3618_v12 = vpop.xlane.xlu1 %3617 }
0x1306   : > { %v3628_v13 = vmul.f32 0.03125, %v3618_v12 }
0x1307   : > { %v3633_v14 = vadd.f32 1e-05, %v3629_v63 }
0x1308   : > { %v3632_v20 = vadd.f32 1e-05, %v3628_v13  ;;  %v4129_v13 = vld [vmem:[%s5777_s4] ss:$0 sm:$0xff] (!%p4128_p6) }
0x1309   : > { %4824 = vrsqrt.f32 %v3633_v14  ;;  %v3627_v21 = vpop.xlane.xlu0 %3626 }
0x130a   : > { %4826 = vrsqrt.f32 %v3632_v20  ;;  %v3631_v22 = vmul.f32 0.03125, %v3627_v21  ;;  %v3624_v23 = vpop.xlane.xlu1 %3623 }
0x130b   : > { %v3630_v24 = vmul.f32 0.03125, %v3624_v23 }
0x130c   : > { %v3635_v25 = vadd.f32 1e-05, %v3631_v22  ;;  %v4130_v22 = vld [vmem:[%s5778_s24] ss:$0 sm:$0xff] (!%p4128_p6) }
0x130d   : > { %v3634_v26 = vadd.f32 1e-05, %v3630_v24 }
0x130e   : > { %4828 = vrsqrt.f32 %v3635_v25 }
0x130f   : > { %4830 = vrsqrt.f32 %v3634_v26 }
0x1313   : > { %v4825_v27 = vpop.eup %4824 }
0x1314   : > { %v4827_v28 = vpop.eup %4826  ;;  %v3641_v29 = vmul.f32 %v4825_v27, %v3609_v1 }
0x1315   : > { %v3640_v31 = vmul.f32 %v4827_v28, %v3608_v10 }
0x1316   : > { %v3651_v32 = vmul.f32 %v4126_v19, %v3641_v29 }
0x1317   : > { %v3650_v33 = vmul.f32 %v4126_v19, %v3640_v31 }
0x1318   : > { %v4829_v34 = vpop.eup %4828  ;;  %v3661_v35 = vadd.f32 %v4127_v30, %v3651_v32 }
0x1319   : > { %v4831_v36 = vpop.eup %4830  ;;  %v3660_v38 = vadd.f32 %v4127_v30, %v3650_v33  ;;  %v3643_v4 = vmul.f32 %v4829_v34, %v3611_v17 }
0x131a   : > { %3665 = vst.msk [vmem:[#allocation2 + $0x8] sm:$0xff] %vm1123_vm1, %v3661_v35  ;;  %v3642_v40 = vmul.f32 %v4831_v36, %v3610_v5  ;;  %3671 = sbr.rel (%p4128_p6) target bundleno = 5406 (0x151e), region = 132  ;;  %v3677_v49 = vsel (!%p4128_p6), %vm1123_vm1, %v3661_v35, 0.0 }
0x131b   : > { %3664 = vst.msk [vmem:[#allocation2] sm:$0xff] %vm1123_vm1, %v3660_v38  ;;  %v3653_v41 = vmul.f32 %v4126_v19, %v3643_v4  ;;  %v3674_v47 = vsel (!%p4128_p6), %vm1123_vm1, %v3660_v38, 0.0 }
0x131c   : > { %v3652_v42 = vmul.f32 %v4126_v19, %v3642_v40  ;;  %3675 = vadd.xlane.f32.xlu0 (!%p4128_p6), %v3674_v47 }
0x131d   : > { %v3663_v43 = vadd.f32 %v4127_v30, %v3653_v41 }
0x131e   : > { %v3662_v45 = vadd.f32 %v4127_v30, %v3652_v42 }
0x131f   : > { %3667 = vst.msk [vmem:[#allocation2 + $0x18] sm:$0xff] %vm1123_vm1, %v3663_v43  ;;  %v3683_v50 = vsel (!%p4128_p6), %vm1123_vm1, %v3663_v43, 0.0 }
0x1320   : > { %3666 = vst.msk [vmem:[#allocation2 + $0x10] sm:$0xff] %vm1123_vm1, %v3662_v45  ;;  %v3680_v48 = vsel (!%p4128_p6), %vm1123_vm1, %v3662_v45, 0.0  ;;  %3678 = vadd.xlane.f32.xlu0 (!%p4128_p6), %v3677_v49 }
0x1321   : > { %3681 = vadd.xlane.f32.xlu1 %v3680_v48 }
0x1325   : > { %3684 = vadd.xlane.f32.xlu1 %v3683_v50 }
0x13a9   : > { %v3676_v51 = vpop.xlane.xlu0 %3675 }
0x13aa   : > { %v3686_v53 = vmul.f32 0.03125, %v3676_v51 }
0x13ac   : > { %v3690_v55 = vsub.f32 %v3660_v38, %v3686_v53  ;;  %v3767_v53 = vld [vmem:[%s5779_s19] sm:$0x1] }
0x13ad   : > { %v3679_v57 = vpop.xlane.xlu0 %3678 }
0x13ae   : > { %v3682_v52 = vpop.xlane.xlu1 %3681  ;;  %v3687_v61 = vmul.f32 0.03125, %v3679_v57  ;;  %v3694_v37 = vmul.f32 %v3690_v55, %v3690_v55 }
0x13af   : > { %v3688_v54 = vmul.f32 0.03125, %v3682_v52 }
0x13b0   : > { %v3691_v11 = vsub.f32 %v3661_v35, %v3687_v61  ;;  %v3698_v1 = vsel %vm1123_vm1, %v3694_v37, 0.0 }
0x13b1   : > { %v3692_v56 = vsub.f32 %v3662_v45, %v3688_v54  ;;  %3699 = vadd.xlane.f32.xlu0 %v3698_v1 }
0x13b2   : > { %v3685_v60 = vpop.xlane.xlu1 %3684  ;;  %v3695_v2 = vmul.f32 %v3691_v11, %v3691_v11 }
0x13b3   : > { %v3689_v39 = vmul.f32 0.03125, %v3685_v60  ;;  %v3696_v59 = vmul.f32 %v3692_v56, %v3692_v56 }
0x13b4   : > { %v3701_v15 = vsel %vm1123_vm1, %v3695_v2, 0.0 }
0x13b5   : > { %v3693_v62 = vsub.f32 %v3663_v43, %v3689_v39  ;;  %v3704_v10 = vsel %vm1123_vm1, %v3696_v59, 0.0  ;;  %3702 = vadd.xlane.f32.xlu1 %v3701_v15  ;;  %v3777_v59 = vld [vmem:[#allocation3] sm:$0x1] }
0x13b6   : > { %3705 = vadd.xlane.f32.xlu0 %v3704_v10 }
0x13b7   : > { %v3697_v16 = vmul.f32 %v3693_v62, %v3693_v62 }
0x13b9   : > { %v3707_v0 = vsel %vm1123_vm1, %v3697_v16, 0.0 }
0x13ba   : > { %3708 = vadd.xlane.f32.xlu1 %v3707_v0 }
0x143e   : > { %v3700_v3 = vpop.xlane.xlu0 %3699 }
0x143f   : > { %v3710_v46 = vmul.f32 0.03125, %v3700_v3 }
0x1441   : > { %v3714_v44 = vadd.f32 1e-05, %v3710_v46 }
0x1442   : > { %v3703_v17 = vpop.xlane.xlu1 %3702 }
0x1443   : > { %v3706_v18 = vpop.xlane.xlu0 %3705  ;;  %4836 = vrsqrt.f32 %v3714_v44  ;;  %v3711_v5 = vmul.f32 0.03125, %v3703_v17 }
0x1444   : > { %v3712_v6 = vmul.f32 0.03125, %v3706_v18 }
0x1445   : > { %v3715_v7 = vadd.f32 1e-05, %v3711_v5 }
0x1446   : > { %v3716_v8 = vadd.f32 1e-05, %v3712_v6 }
0x1447   : > { %v3709_v9 = vpop.xlane.xlu1 %3708  ;;  %4838 = vrsqrt.f32 %v3715_v7 }
0x1448   : > { %v3713_v58 = vmul.f32 0.03125, %v3709_v9  ;;  %4840 = vrsqrt.f32 %v3716_v8 }
0x144a   : > { %v3717_v63 = vadd.f32 1e-05, %v3713_v58 }
0x144c   : > { %4842 = vrsqrt.f32 %v3717_v63 }
0x144d   : > { %v4837_v12 = vpop.eup %4836 }
0x144e   : > { %v3722_v14 = vmul.f32 %v4837_v12, %v3690_v55 }
0x1450   : > { %v3732_v20 = vmul.f32 %v4129_v13, %v3722_v14 }
0x1451   : > { %v4839_v21 = vpop.eup %4838 }
0x1452   : > { %v4841_v23 = vpop.eup %4840  ;;  %v3723_v24 = vmul.f32 %v4839_v21, %v3691_v11  ;;  %v3742_v27 = vadd.f32 %v4130_v22, %v3732_v20 }
0x1453   : > { %v3724_v25 = vmul.f32 %v4841_v23, %v3692_v56 }
0x1454   : > { %v3733_v26 = vmul.f32 %v4129_v13, %v3723_v24  ;;  %v3746_v31 = vsel %vm1123_vm1, %v3742_v27, 0.0 }
0x1455   : > { %v3734_v28 = vmul.f32 %v4129_v13, %v3724_v25 }
0x1456   : > { %v4843_v19 = vpop.eup %4842  ;;  %v3743_v30 = vadd.f32 %v4130_v22, %v3733_v26 }
0x1457   : > { %v3725_v29 = vmul.f32 %v4843_v19, %v3693_v62  ;;  %v3744_v34 = vadd.f32 %v4130_v22, %v3734_v28 }
0x1458   : > { %v3747_v32 = vsel %vm1123_vm1, %v3743_v30, 0.0 }
0x1459   : > { %v3735_v33 = vmul.f32 %v4129_v13, %v3725_v29  ;;  %v3748_v35 = vadd.f32 %v3747_v32, %v3746_v31  ;;  %v3755_v4 = vsel %vm1123_vm1, %v3744_v34, 0.0 }
0x145b   : > { %v3745_v36 = vadd.f32 %v4130_v22, %v3735_v33  ;;  %v3749_v38 = vrot.slane %v3748_v35, 4 }
0x145d   : > { %v3756_v40 = vsel %vm1123_vm1, %v3745_v36, 0.0  ;;  %v3750_v41 = vadd.f32 %v3749_v38, %v3748_v35 }
0x145e   : > { %v3757_v42 = vadd.f32 %v3756_v40, %v3755_v4 }
0x145f   : > { %v3751_v43 = vrot.slane %v3750_v41, 2 }
0x1460   : > { %v3758_v45 = vrot.slane %v3757_v42, 4 }
0x1461   : > { %v3752_v47 = vadd.f32 %v3751_v43, %v3750_v41 }
0x1462   : > { %v3759_v48 = vadd.f32 %v3758_v45, %v3757_v42 }
0x1463   : > { %v3753_v49 = vrot.slane %v3752_v47, 1 }
0x1464   : > { %v3760_v50 = vrot.slane %v3759_v48, 2 }
0x1465   : > { %v3754_v51 = vadd.f32 %v3753_v49, %v3752_v47 }
0x1466   : > { %v3761_v52 = vadd.f32 %v3760_v50, %v3759_v48 }
0x1467   : > { %v3765_v54 = vmul.f32 0.0625, %v3754_v51 }
0x1468   : > { %v3762_v55 = vrot.slane %v3761_v52, 1 }
0x1469   : > { %v3768_v56 = vmul.f32 %v3767_v53, %v3765_v54 }
0x146a   : > { %v3763_v57 = vadd.f32 %v3762_v55, %v3761_v52 }
0x146b   : > { %v3771_v60 = vsel %vm3770_vm6, %v3768_v56, 0.0 }
0x146c   : > { %v3766_v61 = vmul.f32 0.0625, %v3763_v57  ;;  %3772 = vadd.xlane.f32.xlu0 %v3771_v60 }
0x146e   : > { %v3769_v39 = vmul.f32 %v3767_v53, %v3766_v61 }
0x1470   : > { %v3774_v37 = vsel %vm3770_vm6, %v3769_v39, 0.0 }
0x1471   : > { %3775 = vadd.xlane.f32.xlu1 %v3774_v37 }
0x14f9   : > { %v3773_v11 = vpop.xlane.xlu0 %3772 }
0x14fa   : > { %v3778_v62 = vadd.f32 %v3777_v59, %v3773_v11 }
0x14fc   : > { %v3780_v1 = vsub.f32 0.0, %v3778_v62 }
0x14fe   : > { %v3776_v10 = vpop.xlane.xlu1 %3775  ;;  %v3782_v2 = vmul.f32 1.442695, %v3780_v1 }
0x14ff   : > { %v3779_v16 = vadd.f32 %v3777_v59, %v3776_v10 }
0x1500   : > { %4844 = vpow2.f32 %v3782_v2 }
0x1501   : > { %v3781_v15 = vsub.f32 0.0, %v3779_v16 }
0x1503   : > { %v3784_v0 = vmul.f32 1.442695, %v3781_v15 }
0x1505   : > { %4846 = vpow2.f32 %v3784_v0 }
0x150a   : > { %v4845_v3 = vpop.eup %4844 }
0x150b   : > { %v3786_v46 = vadd.f32 1.0, %v4845_v3 }
0x150d   : > { %4848 = vrcp.f32 %v3786_v46 }
0x150f   : > { %v4847_v44 = vpop.eup %4846 }
0x1510   : > { %v3787_v17 = vadd.f32 1.0, %v4847_v44 }
0x1512   : > { %4850 = vrcp.f32 %v3787_v17 }
0x1517   : > { %v4849_v18 = vpop.eup %4848 }
0x1518   : > { %3793 = vst.msk [vmem:[%s5780_s23] sm:$0x1] %vm3792_vm7, %v4849_v18 }
0x151c   : > { %v4851_v5 = vpop.eup %4850 }
0x151d   : > { %3794 = vst.msk [vmem:[%s5780_s23 + $0x1] sm:$0x1] %vm3792_vm7, %v4851_v5 }
0x151e PF: > { %s5781_s3 = sld [smem:[#allocation15_spill]]  ;;  %s5782_s29 = sld [smem:[#allocation14_spill]] }
0x151f   : > { %s5783_s30 = sld [smem:[#allocation16_spill]] }
0x1524   : > { %s37_s4 = sadd.s32 1, %s5781_s3  }
0x1525   : > { %p34_p9 = scmp.ge.s32.totalorder %s37_s4, 4  }
0x1527   :  { %36 = sbr.rel (!%p34_p9) target bundleno = 19 (0x13), region = 202 }
0x152e   :  { %3815 = vsyncpa [#allocation5], 1 }
0x152f   :  { %3817 = vsyncpa [#allocation5 + $0x1], 1 }
0x1530   :  { %3818 = vsyncpa [#allocation7], 1 }
0x1531   :  { %3819 = vsyncpa [#allocation10], 1 }

</bundles_post_ra>
